<compile_context>
chip_gen: v7x
topology: tpu7x:2x2x1
jax: 0.10.0
libtpu: 0.0.40
codegen_flags: <defaults>
</compile_context>

<pallas_src>
import functools

import numpy as np
import jax
import jax.numpy as jnp
from jax.experimental import pallas as pl
from jax.experimental.pallas import tpu as pltpu


C_PAD = 128                      # lane-dense classifier output width
_M_TILE_CAP = 1024               # row tile for conv matmul kernels (mem-bound: big tiles)
_VMEM_LIMIT = 32 * 1024 * 1024   # safe on 64 MiB v7x and 128 MiB v5e/v6e


def _compiler_params(n_parallel_axes):
    return pltpu.CompilerParams(
        dimension_semantics=("parallel",) * n_parallel_axes,
        vmem_limit_bytes=_VMEM_LIMIT,
    )


# ----------------------------------------------------------------------------------
# Pallas kernels
# ----------------------------------------------------------------------------------

def _matmul_bias_kernel(a_ref, w_ref, b_ref, o_ref, *, relu):
    # conv-as-matmul: bf16 inputs, f32 MXU accumulation, f32 epilogue, cast at store.
    acc = jnp.dot(a_ref[...], w_ref[...], preferred_element_type=jnp.float32)
    acc = acc + b_ref[...]
    if relu:
        acc = jnp.maximum(acc, 0.0)
    o_ref[...] = acc.astype(o_ref.dtype)


def _matmul_bias2_kernel(a_ref, w1_ref, b1_ref, w2_ref, b2_ref, o_ref, *, relu2):
    # fused conv matmul (+bias+ReLU) chained into a 1x1 conv (+bias [,ReLU]);
    # both weights stay resident in VMEM, the hidden activation never touches HBM.
    h = jnp.dot(a_ref[...], w1_ref[...], preferred_element_type=jnp.float32)
    h = jnp.maximum(h + b1_ref[...], 0.0)
    acc = jnp.dot(h.astype(w2_ref.dtype), w2_ref[...], preferred_element_type=jnp.float32)
    acc = acc + b2_ref[...]
    if relu2:
        acc = jnp.maximum(acc, 0.0)
    o_ref[...] = acc.astype(o_ref.dtype)


def _head_cls_kernel(xp_ref, w1_ref, b1_ref, w2_ref, b2_ref, o_ref, *, wp, cin):
    # Halo-rows fused (3x3 head conv + 1x1 classifier) for one batch image.
    #   xp_ref: (1, hp*wp, cin)  zero-padded activation, spatially flattened in HBM.
    #   o_ref : (1, h*wp, 128)   output rows in padded-column order; the wrapper drops
    #                            the (discarded) pad-column rows with a cheap slice.
    # The 9 taps are statically-offset row slices of the SAME padded slab, so the 9x
    # im2col expansion never touches HBM.  Output pixel q = i*wp + j uses padded rows
    # q + di*wp + dj, di,dj in [0,3).
    m = o_ref.shape[1]
    cmid = w1_ref.shape[1]
    acc = jnp.zeros((m, cmid), jnp.float32)
    for t in range(9):
        di, dj = divmod(t, 3)
        off = di * wp + dj
        acc = acc + jnp.dot(xp_ref[0, off:off + m, :],
                            w1_ref[t * cin:(t + 1) * cin, :],
                            preferred_element_type=jnp.float32)
    hid = jnp.maximum(acc + b1_ref[...], 0.0)
    out = jnp.dot(hid.astype(w2_ref.dtype), w2_ref[...],
                  preferred_element_type=jnp.float32) + b2_ref[...]
    o_ref[0] = out.astype(o_ref.dtype)


def _upsample_kernel(lo_ref, ah_ref, awt_ref, o_ref):
    # bilinear resize of one (batch, class) plane: A_h @ X @ A_w^T, NCHW-direct store
    # (lane dim = output W -> lane-dense, and no full-res transpose in HBM).
    x = lo_ref[0, 0]                                                     # (h, w)
    t = jnp.dot(ah_ref[...], x, preferred_element_type=jnp.float32)      # (H, w)
    o_ref[0, 0] = jnp.dot(t, awt_ref[...], preferred_element_type=jnp.float32)  # (H, W)


# ----------------------------------------------------------------------------------
# Pallas call wrappers
# ----------------------------------------------------------------------------------

def _pick_tm(m):
    # largest M tile up to the cap; m itself is always a legal full-extent block,
    # the capped tile is a multiple of 8 and ragged edges are handled by pl.cdiv.
    return m if m <= _M_TILE_CAP else _M_TILE_CAP


def matmul_bias(a, w, b, *, relu, out_dtype):
    m, k = a.shape
    n = w.shape[1]
    tm = _pick_tm(m)
    return pl.pallas_call(
        functools.partial(_matmul_bias_kernel, relu=relu),
        out_shape=jax.ShapeDtypeStruct((m, n), out_dtype),
        grid=(pl.cdiv(m, tm),),
        in_specs=[
            pl.BlockSpec((tm, k), lambda i: (i, 0)),
            pl.BlockSpec((k, n), lambda i: (0, 0)),
            pl.BlockSpec((1, n), lambda i: (0, 0)),
        ],
        out_specs=pl.BlockSpec((tm, n), lambda i: (i, 0)),
        compiler_params=_compiler_params(1),
    )(a, w, b.reshape(1, n))


def matmul_bias2(a, w1, b1, w2, b2, *, relu2, out_dtype):
    m, k = a.shape
    n1 = w1.shape[1]
    n2 = w2.shape[1]
    tm = _pick_tm(m)
    return pl.pallas_call(
        functools.partial(_matmul_bias2_kernel, relu2=relu2),
        out_shape=jax.ShapeDtypeStruct((m, n2), out_dtype),
        grid=(pl.cdiv(m, tm),),
        in_specs=[
            pl.BlockSpec((tm, k), lambda i: (i, 0)),
            pl.BlockSpec((k, n1), lambda i: (0, 0)),
            pl.BlockSpec((1, n1), lambda i: (0, 0)),
            pl.BlockSpec((n1, n2), lambda i: (0, 0)),
            pl.BlockSpec((1, n2), lambda i: (0, 0)),
        ],
        out_specs=pl.BlockSpec((tm, n2), lambda i: (i, 0)),
        compiler_params=_compiler_params(1),
    )(a, w1, b1.reshape(1, n1), w2, b2.reshape(1, n2))


def head_classifier_fused(xp_flat, w1, b1, w2, b2, *, m_out, wp, out_dtype):
    """Per-batch-image halo-rows 3x3 conv fused with the 1x1 classifier."""
    n, mp, cin = xp_flat.shape
    cmid = w1.shape[1]
    n2 = w2.shape[1]
    return pl.pallas_call(
        functools.partial(_head_cls_kernel, wp=wp, cin=cin),
        out_shape=jax.ShapeDtypeStruct((n, m_out, n2), out_dtype),
        grid=(n,),
        in_specs=[
            pl.BlockSpec((1, mp, cin), lambda b: (b, 0, 0)),
            pl.BlockSpec((9 * cin, cmid), lambda b: (0, 0)),
            pl.BlockSpec((1, cmid), lambda b: (0, 0)),
            pl.BlockSpec((cmid, n2), lambda b: (0, 0)),
            pl.BlockSpec((1, n2), lambda b: (0, 0)),
        ],
        out_specs=pl.BlockSpec((1, m_out, n2), lambda b: (b, 0, 0)),
        compiler_params=_compiler_params(1),
    )(xp_flat, w1, b1.reshape(1, cmid), w2, b2.reshape(1, n2))


def bilinear_upsample_nchw(lo_nchw, h_out, w_out):
    """Fused bilinear upsample (align_corners=False). One grid step per (batch, class)
    plane; interpolation matrices stay resident in VMEM; output written NCHW directly."""
    n, c, h, w = lo_nchw.shape
    a_h = jnp.asarray(_bilinear_matrix(h_out, h))       # (H_out, h)
    a_wt = jnp.asarray(_bilinear_matrix(w_out, w).T)    # (w, W_out)
    return pl.pallas_call(
        _upsample_kernel,
        out_shape=jax.ShapeDtypeStruct((n, c, h_out, w_out), jnp.float32),
        grid=(n, c),
        in_specs=[
            pl.BlockSpec((1, 1, h, w), lambda i, j: (i, j, 0, 0)),
            pl.BlockSpec((h_out, h), lambda i, j: (0, 0)),
            pl.BlockSpec((w, w_out), lambda i, j: (0, 0)),
        ],
        out_specs=pl.BlockSpec((1, 1, h_out, w_out), lambda i, j: (i, j, 0, 0)),
        compiler_params=_compiler_params(2),
    )(lo_nchw, a_h, a_wt)


# ----------------------------------------------------------------------------------
# JAX glue: im2col (pad + strided slices), bilinear matrices, parameter init
# ----------------------------------------------------------------------------------

def _im2col(x_nhwc, k, stride, pad):
    """x: (N,H,W,C) -> patches (N*Ho*Wo, k*k*C); patch column order (kh, kw, Cin)."""
    n, h, w, c = x_nhwc.shape
    xp = jnp.pad(x_nhwc, ((0, 0), (pad, pad), (pad, pad), (0, 0)))
    ho = (h + 2 * pad - k) // stride + 1
    wo = (w + 2 * pad - k) // stride + 1
    patches = []
    for di in range(k):
        for dj in range(k):
            patches.append(
                xp[:, di:di + stride * ho:stride, dj:dj + stride * wo:stride, :])
    cols = jnp.concatenate(patches, axis=-1)          # (N, Ho, Wo, k*k*C)
    return cols.reshape(n * ho * wo, k * k * c), (n, ho, wo)


def _bilinear_matrix(out_size, in_size):
    """Bilinear interpolation matrix, align_corners=False (F.interpolate default)."""
    scale = in_size / out_size
    i = np.arange(out_size)
    src = np.clip((i + 0.5) * scale - 0.5, 0.0, in_size - 1)
    i0 = np.floor(src).astype(np.int64)
    i1 = np.minimum(i0 + 1, in_size - 1)
    w1 = (src - i0).astype(np.float32)
    w0 = 1.0 - w1
    A = np.zeros((out_size, in_size), np.float32)
    A[np.arange(out_size), i0] += w0
    A[np.arange(out_size), i1] += w1
    return A


def _conv_weight(key, k, cin, cout):
    fan_in = k * k * cin
    return (jax.random.normal(key, (k * k * cin, cout), jnp.float32)
            / np.sqrt(fan_in)).astype(jnp.float32)


def init_params(num_classes=23, seed=42):
    keys = jax.random.split(jax.random.PRNGKey(seed), 5)
    c_stem, c_back, c_head = 16, 32, 32
    w_cls = _conv_weight(keys[4], 1, c_head, num_classes)
    params = {
        # preprocess (ImageNet normalize) -- folded into the stem conv at forward time
        "mean": jnp.asarray([0.485, 0.456, 0.406], jnp.float32),
        "inv_std": 1.0 / jnp.asarray([0.229, 0.224, 0.225], jnp.float32),
        # abbreviated frozen backbone (stride-2 convs -> output stride 4)
        "w_stem": _conv_weight(keys[0], 3, 3, c_stem),
        "b_stem": jnp.zeros((c_stem,), jnp.float32),
        "w_back": _conv_weight(keys[1], 3, c_stem, c_back),
        "b_back": jnp.zeros((c_back,), jnp.float32),
        # ASPP-style 1x1 projection
        "w_aspp": _conv_weight(keys[2], 1, c_back, c_head),
        "b_aspp": jnp.zeros((c_head,), jnp.float32),
        # classifier head 3x3 conv
        "w_head": _conv_weight(keys[3], 3, c_head, c_head),
        "b_head": jnp.zeros((c_head,), jnp.float32),
        # replaced classifier[4]: 1x1 conv -> num_classes, zero-padded to 128 lanes
        "w_cls": jnp.pad(w_cls, ((0, 0), (0, C_PAD - num_classes))),
        "b_cls": jnp.zeros((C_PAD,), jnp.float32),
    }
    return params


# ----------------------------------------------------------------------------------
# Forward pass (mirrors SegmentationNN.forward: preprocess -> model(x)['out'])
# ----------------------------------------------------------------------------------

def segmentation_nn_forward(params, x_nchw, *, num_classes=23):
    n, c, h, w = x_nchw.shape
    assert c == 3, "preprocess normalize expects 3-channel input"

    # preprocess folded into the stem conv: normalize(x) = (x - mean) * inv_std.
    # Zero padding commutes with the per-channel scale, so the mean-subtract fuses
    # into the XLA layout transform and inv_std scales the stem weight rows. Exact.
    mean = params["mean"].reshape(1, 3, 1, 1)
    x = jnp.transpose(x_nchw.astype(jnp.float32) - mean, (0, 2, 3, 1))   # NHWC, mean-free
    x = x.astype(jnp.bfloat16)

    w_stem = (params["w_stem"] * jnp.tile(params["inv_std"], 9)[:, None]).astype(jnp.bfloat16)
    w_back = params["w_back"].astype(jnp.bfloat16)
    w_aspp = params["w_aspp"].astype(jnp.bfloat16)
    w_head = params["w_head"].astype(jnp.bfloat16)
    w_cls = params["w_cls"].astype(jnp.bfloat16)

    # stage 1: stem 3x3 stride-2 conv (+ReLU)
    cols1, (_, h2, w2) = _im2col(x, k=3, stride=2, pad=1)                # (M1, 27) bf16
    a1 = matmul_bias(cols1, w_stem, params["b_stem"], relu=True,
                     out_dtype=jnp.bfloat16).reshape(n, h2, w2, -1)

    # stage 2: backbone 3x3 stride-2 conv + ASPP-style 1x1 projection, fused
    cols2, (_, h4, w4) = _im2col(a1, k=3, stride=2, pad=1)               # (M2, 144) bf16
    a2 = matmul_bias2(cols2, w_back, params["b_back"], w_aspp, params["b_aspp"],
                      relu2=True, out_dtype=jnp.bfloat16).reshape(n, h4, w4, -1)

    # stage 3: head 3x3 conv + replaced 1x1 classifier, fused halo-rows kernel.
    # Pad H by (1,2) / W by (1,1): pad-1 conv halo + 2 extra zero rows so all 9 tap
    # offsets stay in-bounds for every computed output row.  Pad-column output rows
    # are garbage and sliced away on the tiny low-res tensor below.
    c_head = a2.shape[-1]
    wp = w4 + 2
    xp = jnp.pad(a2, ((0, 0), (1, 2), (1, 1), (0, 0)))                   # (n, h4+3, wp, c)
    xp_flat = xp.reshape(n, (h4 + 3) * wp, c_head)
    out3 = head_classifier_fused(xp_flat, w_head, params["b_head"],
                                 w_cls, params["b_cls"],
                                 m_out=h4 * wp, wp=wp, out_dtype=jnp.float32)  # (n, h4*wp, 128)
    logits = out3.reshape(n, h4, wp, C_PAD)[:, :, :w4, :num_classes]     # drop pad cols/classes
    lo = jnp.transpose(logits, (0, 3, 1, 2))                             # (N, nc, h4, w4)

    # stage 4: fused bilinear upsample to input resolution, NCHW-direct output
    return bilinear_upsample_nchw(lo, h, w)                              # (N, nc, H, W) f32


if __name__ == "__main__":
    num_classes = 23
    params = init_params(num_classes=num_classes, seed=42)

    key = jax.random.PRNGKey(0)
    x = jax.random.uniform(key, (2, 3, 16, 16), dtype=jnp.float32)       # images in [0, 1]

    fwd = jax.jit(functools.partial(segmentation_nn_forward, num_classes=num_classes))
    out = jax.block_until_ready(fwd(params, x))

    assert out.shape == (2, num_classes, 16, 16), out.shape
    assert out.dtype == jnp.float32
    assert bool(jnp.all(jnp.isfinite(out)))
    print("KERNEL_OK")
</pallas_src>

<mosaic_0001>
module attributes {stable_mosaic.version = 11 : i64} {
  func.func @_matmul_bias_kernel(%arg0: i32, %arg1: memref<128x27xbf16, #tpu.memory_space<vmem>>, %arg2: memref<27x16xbf16, #tpu.memory_space<vmem>>, %arg3: memref<1x16xf32, #tpu.memory_space<vmem>>, %arg4: memref<128x16xbf16, #tpu.memory_space<vmem>>) attributes {dimension_semantics = [#tpu.dimension_semantics<parallel>], iteration_bounds = array<i64: 1>, scalar_prefetch = 0 : i64, scratch_operands = 0 : i64, tpu.core_type = #tpu.core_type<tc>, window_params = [{transform_indices = @transform_0, window_bounds = array<i64: 128, 27>}, {pipeline_mode = #tpu.pipeline_mode<synchronous>, transform_indices = @transform_1, window_bounds = array<i64: 27, 16>}, {pipeline_mode = #tpu.pipeline_mode<synchronous>, transform_indices = @transform_2, window_bounds = array<i64: 1, 16>}, {transform_indices = @transform_3, window_bounds = array<i64: 128, 16>}]} {
    %c0 = arith.constant 0 : index
    %c0_0 = arith.constant 0 : index
    %0 = vector.load %arg1[%c0, %c0_0] : memref<128x27xbf16, #tpu.memory_space<vmem>>, vector<128x27xbf16>
    %c0_1 = arith.constant 0 : index
    %c0_2 = arith.constant 0 : index
    %1 = vector.load %arg2[%c0_1, %c0_2] : memref<27x16xbf16, #tpu.memory_space<vmem>>, vector<27x16xbf16>
    %cst = arith.constant dense<0.000000e+00> : vector<128x16xf32>
    %2 = tpu.matmul %0, %1, %cst {dimension_numbers = #tpu.dot_dimension_numbers<[1], [0], [0], [1], [0, 0, 1, 1], [], []>} : vector<128x27xbf16>, vector<27x16xbf16>, vector<128x16xf32> -> vector<128x16xf32>
    %c0_3 = arith.constant 0 : index
    %c0_4 = arith.constant 0 : index
    %3 = vector.load %arg3[%c0_3, %c0_4] : memref<1x16xf32, #tpu.memory_space<vmem>>, vector<1x16xf32>
    %4 = vector.broadcast %3 : vector<1x16xf32> to vector<128x16xf32>
    %5 = arith.addf %2, %4 : vector<128x16xf32>
    %cst_5 = arith.constant 0.000000e+00 : f32
    %6 = vector.broadcast %cst_5 : f32 to vector<128x16xf32>
    %7 = arith.maximumf %5, %6 : vector<128x16xf32>
    %8 = arith.truncf %7 : vector<128x16xf32> to vector<128x16xbf16>
    %c0_6 = arith.constant 0 : index
    %c0_7 = arith.constant 0 : index
    %9 = vector.load %arg4[%c0_6, %c0_7] : memref<128x16xbf16, #tpu.memory_space<vmem>>, vector<128x16xbf16>
    tpu.vector_store %arg4[%c0_6, %c0_7], %8 {strides = array<i32>} : memref<128x16xbf16, #tpu.memory_space<vmem>>, vector<128x16xbf16>,
    return
  }
  func.func @transform_0(%arg0: i32) -> (i32, i32) {
    %c0_i32 = arith.constant 0 : i32
    %c0_i32_0 = arith.constant 0 : i32
    return %arg0, %c0_i32 : i32, i32
  }
  func.func @transform_1(%arg0: i32) -> (i32, i32) {
    %c0_i32 = arith.constant 0 : i32
    %c0_i32_0 = arith.constant 0 : i32
    %c0_i32_1 = arith.constant 0 : i32
    return %c0_i32, %c0_i32_0 : i32, i32
  }
  func.func @transform_2(%arg0: i32) -> (i32, i32) {
    %c0_i32 = arith.constant 0 : i32
    %c0_i32_0 = arith.constant 0 : i32
    %c0_i32_1 = arith.constant 0 : i32
    return %c0_i32, %c0_i32_0 : i32, i32
  }
  func.func @transform_3(%arg0: i32) -> (i32, i32) {
    %c0_i32 = arith.constant 0 : i32
    %c0_i32_0 = arith.constant 0 : i32
    return %arg0, %c0_i32 : i32, i32
  }
}

module attributes {stable_mosaic.version = 11 : i64} {
  func.func @_matmul_bias2_kernel(%arg0: i32, %arg1: memref<32x144xbf16, #tpu.memory_space<vmem>>, %arg2: memref<144x32xbf16, #tpu.memory_space<vmem>>, %arg3: memref<1x32xf32, #tpu.memory_space<vmem>>, %arg4: memref<32x32xbf16, #tpu.memory_space<vmem>>, %arg5: memref<1x32xf32, #tpu.memory_space<vmem>>, %arg6: memref<32x32xbf16, #tpu.memory_space<vmem>>) attributes {dimension_semantics = [#tpu.dimension_semantics<parallel>], iteration_bounds = array<i64: 1>, scalar_prefetch = 0 : i64, scratch_operands = 0 : i64, tpu.core_type = #tpu.core_type<tc>, window_params = [{transform_indices = @transform_0, window_bounds = array<i64: 32, 144>}, {pipeline_mode = #tpu.pipeline_mode<synchronous>, transform_indices = @transform_1, window_bounds = array<i64: 144, 32>}, {pipeline_mode = #tpu.pipeline_mode<synchronous>, transform_indices = @transform_2, window_bounds = array<i64: 1, 32>}, {pipeline_mode = #tpu.pipeline_mode<synchronous>, transform_indices = @transform_3, window_bounds = array<i64: 32, 32>}, {pipeline_mode = #tpu.pipeline_mode<synchronous>, transform_indices = @transform_4, window_bounds = array<i64: 1, 32>}, {transform_indices = @transform_5, window_bounds = array<i64: 32, 32>}]} {
    %c0 = arith.constant 0 : index
    %c0_0 = arith.constant 0 : index
    %0 = vector.load %arg1[%c0, %c0_0] : memref<32x144xbf16, #tpu.memory_space<vmem>>, vector<32x144xbf16>
    %c0_1 = arith.constant 0 : index
    %c0_2 = arith.constant 0 : index
    %1 = vector.load %arg2[%c0_1, %c0_2] : memref<144x32xbf16, #tpu.memory_space<vmem>>, vector<144x32xbf16>
    %cst = arith.constant dense<0.000000e+00> : vector<32x32xf32>
    %2 = tpu.matmul %0, %1, %cst {dimension_numbers = #tpu.dot_dimension_numbers<[1], [0], [0], [1], [0, 0, 1, 1], [], []>} : vector<32x144xbf16>, vector<144x32xbf16>, vector<32x32xf32> -> vector<32x32xf32>
    %c0_3 = arith.constant 0 : index
    %c0_4 = arith.constant 0 : index
    %3 = vector.load %arg3[%c0_3, %c0_4] : memref<1x32xf32, #tpu.memory_space<vmem>>, vector<1x32xf32>
    %4 = vector.broadcast %3 : vector<1x32xf32> to vector<32x32xf32>
    %5 = arith.addf %2, %4 : vector<32x32xf32>
    %cst_5 = arith.constant 0.000000e+00 : f32
    %6 = vector.broadcast %cst_5 : f32 to vector<32x32xf32>
    %7 = arith.maximumf %5, %6 : vector<32x32xf32>
    %8 = arith.truncf %7 : vector<32x32xf32> to vector<32x32xbf16>
    %c0_6 = arith.constant 0 : index
    %c0_7 = arith.constant 0 : index
    %9 = vector.load %arg4[%c0_6, %c0_7] : memref<32x32xbf16, #tpu.memory_space<vmem>>, vector<32x32xbf16>
    %cst_8 = arith.constant dense<0.000000e+00> : vector<32x32xf32>
    %10 = tpu.matmul %8, %9, %cst_8 {dimension_numbers = #tpu.dot_dimension_numbers<[1], [0], [0], [1], [0, 0, 1, 1], [], []>} : vector<32x32xbf16>, vector<32x32xbf16>, vector<32x32xf32> -> vector<32x32xf32>
    %c0_9 = arith.constant 0 : index
    %c0_10 = arith.constant 0 : index
    %11 = vector.load %arg5[%c0_9, %c0_10] : memref<1x32xf32, #tpu.memory_space<vmem>>, vector<1x32xf32>
    %12 = vector.broadcast %11 : vector<1x32xf32> to vector<32x32xf32>
    %13 = arith.addf %10, %12 : vector<32x32xf32>
    %cst_11 = arith.constant 0.000000e+00 : f32
    %14 = vector.broadcast %cst_11 : f32 to vector<32x32xf32>
    %15 = arith.maximumf %13, %14 : vector<32x32xf32>
    %16 = arith.truncf %15 : vector<32x32xf32> to vector<32x32xbf16>
    %c0_12 = arith.constant 0 : index
    %c0_13 = arith.constant 0 : index
    %17 = vector.load %arg6[%c0_12, %c0_13] : memref<32x32xbf16, #tpu.memory_space<vmem>>, vector<32x32xbf16>
    tpu.vector_store %arg6[%c0_12, %c0_13], %16 {strides = array<i32>} : memref<32x32xbf16, #tpu.memory_space<vmem>>, vector<32x32xbf16>,
    return
  }
  func.func @transform_0(%arg0: i32) -> (i32, i32) {
    %c0_i32 = arith.constant 0 : i32
    %c0_i32_0 = arith.constant 0 : i32
    return %arg0, %c0_i32 : i32, i32
  }
  func.func @transform_1(%arg0: i32) -> (i32, i32) {
    %c0_i32 = arith.constant 0 : i32
    %c0_i32_0 = arith.constant 0 : i32
    %c0_i32_1 = arith.constant 0 : i32
    return %c0_i32, %c0_i32_0 : i32, i32
  }
  func.func @transform_2(%arg0: i32) -> (i32, i32) {
    %c0_i32 = arith.constant 0 : i32
    %c0_i32_0 = arith.constant 0 : i32
    %c0_i32_1 = arith.constant 0 : i32
    return %c0_i32, %c0_i32_0 : i32, i32
  }
  func.func @transform_3(%arg0: i32) -> (i32, i32) {
    %c0_i32 = arith.constant 0 : i32
    %c0_i32_0 = arith.constant 0 : i32
    %c0_i32_1 = arith.constant 0 : i32
    return %c0_i32, %c0_i32_0 : i32, i32
  }
  func.func @transform_4(%arg0: i32) -> (i32, i32) {
    %c0_i32 = arith.constant 0 : i32
    %c0_i32_0 = arith.constant 0 : i32
    %c0_i32_1 = arith.constant 0 : i32
    return %c0_i32, %c0_i32_0 : i32, i32
  }
  func.func @transform_5(%arg0: i32) -> (i32, i32) {
    %c0_i32 = arith.constant 0 : i32
    %c0_i32_0 = arith.constant 0 : i32
    return %arg0, %c0_i32 : i32, i32
  }
}

module attributes {stable_mosaic.version = 11 : i64} {
  func.func @_head_cls_kernel(%arg0: i32, %arg1: memref<1x42x32xbf16, #tpu.memory_space<vmem>>, %arg2: memref<288x32xbf16, #tpu.memory_space<vmem>>, %arg3: memref<1x32xf32, #tpu.memory_space<vmem>>, %arg4: memref<32x128xbf16, #tpu.memory_space<vmem>>, %arg5: memref<1x128xf32, #tpu.memory_space<vmem>>, %arg6: memref<1x24x128xf32, #tpu.memory_space<vmem>>) attributes {dimension_semantics = [#tpu.dimension_semantics<parallel>], iteration_bounds = array<i64: 2>, scalar_prefetch = 0 : i64, scratch_operands = 0 : i64, tpu.core_type = #tpu.core_type<tc>, window_params = [{transform_indices = @transform_0, window_bounds = array<i64: 1, 42, 32>}, {pipeline_mode = #tpu.pipeline_mode<synchronous>, transform_indices = @transform_1, window_bounds = array<i64: 288, 32>}, {pipeline_mode = #tpu.pipeline_mode<synchronous>, transform_indices = @transform_2, window_bounds = array<i64: 1, 32>}, {pipeline_mode = #tpu.pipeline_mode<synchronous>, transform_indices = @transform_3, window_bounds = array<i64: 32, 128>}, {pipeline_mode = #tpu.pipeline_mode<synchronous>, transform_indices = @transform_4, window_bounds = array<i64: 1, 128>}, {transform_indices = @transform_5, window_bounds = array<i64: 1, 24, 128>}]} {
    %cst = arith.constant 0.000000e+00 : f32
    %0 = vector.broadcast %cst : f32 to vector<24x32xf32>
    %c0 = arith.constant 0 : index
    %c0_0 = arith.constant 0 : index
    %c0_1 = arith.constant 0 : index
    %1 = vector.load %arg1[%c0, %c0_0, %c0_1] : memref<1x42x32xbf16, #tpu.memory_space<vmem>>, vector<1x24x32xbf16>
    %2 = vector.shape_cast %1 : vector<1x24x32xbf16> to vector<24x32xbf16>
    %c0_2 = arith.constant 0 : index
    %c0_3 = arith.constant 0 : index
    %3 = vector.load %arg2[%c0_2, %c0_3] : memref<288x32xbf16, #tpu.memory_space<vmem>>, vector<32x32xbf16>
    %cst_4 = arith.constant dense<0.000000e+00> : vector<24x32xf32>
    %4 = tpu.matmul %2, %3, %cst_4 {dimension_numbers = #tpu.dot_dimension_numbers<[1], [0], [0], [1], [0, 0, 1, 1], [], []>} : vector<24x32xbf16>, vector<32x32xbf16>, vector<24x32xf32> -> vector<24x32xf32>
    %5 = arith.addf %0, %4 : vector<24x32xf32>
    %c0_5 = arith.constant 0 : index
    %c1 = arith.constant 1 : index
    %c0_6 = arith.constant 0 : index
    %6 = vector.load %arg1[%c0_5, %c1, %c0_6] : memref<1x42x32xbf16, #tpu.memory_space<vmem>>, vector<1x24x32xbf16>
    %7 = vector.shape_cast %6 : vector<1x24x32xbf16> to vector<24x32xbf16>
    %c32 = arith.constant 32 : index
    %c0_7 = arith.constant 0 : index
    %8 = vector.load %arg2[%c32, %c0_7] : memref<288x32xbf16, #tpu.memory_space<vmem>>, vector<32x32xbf16>
    %cst_8 = arith.constant dense<0.000000e+00> : vector<24x32xf32>
    %9 = tpu.matmul %7, %8, %cst_8 {dimension_numbers = #tpu.dot_dimension_numbers<[1], [0], [0], [1], [0, 0, 1, 1], [], []>} : vector<24x32xbf16>, vector<32x32xbf16>, vector<24x32xf32> -> vector<24x32xf32>
    %10 = arith.addf %5, %9 : vector<24x32xf32>
    %c0_9 = arith.constant 0 : index
    %c2 = arith.constant 2 : index
    %c0_10 = arith.constant 0 : index
    %11 = vector.load %arg1[%c0_9, %c2, %c0_10] : memref<1x42x32xbf16, #tpu.memory_space<vmem>>, vector<1x24x32xbf16>
    %12 = vector.shape_cast %11 : vector<1x24x32xbf16> to vector<24x32xbf16>
    %c64 = arith.constant 64 : index
    %c0_11 = arith.constant 0 : index
    %13 = vector.load %arg2[%c64, %c0_11] : memref<288x32xbf16, #tpu.memory_space<vmem>>, vector<32x32xbf16>
    %cst_12 = arith.constant dense<0.000000e+00> : vector<24x32xf32>
    %14 = tpu.matmul %12, %13, %cst_12 {dimension_numbers = #tpu.dot_dimension_numbers<[1], [0], [0], [1], [0, 0, 1, 1], [], []>} : vector<24x32xbf16>, vector<32x32xbf16>, vector<24x32xf32> -> vector<24x32xf32>
    %15 = arith.addf %10, %14 : vector<24x32xf32>
    %c0_13 = arith.constant 0 : index
    %c6 = arith.constant 6 : index
    %c0_14 = arith.constant 0 : index
    %16 = vector.load %arg1[%c0_13, %c6, %c0_14] : memref<1x42x32xbf16, #tpu.memory_space<vmem>>, vector<1x24x32xbf16>
    %17 = vector.shape_cast %16 : vector<1x24x32xbf16> to vector<24x32xbf16>
    %c96 = arith.constant 96 : index
    %c0_15 = arith.constant 0 : index
    %18 = vector.load %arg2[%c96, %c0_15] : memref<288x32xbf16, #tpu.memory_space<vmem>>, vector<32x32xbf16>
    %cst_16 = arith.constant dense<0.000000e+00> : vector<24x32xf32>
    %19 = tpu.matmul %17, %18, %cst_16 {dimension_numbers = #tpu.dot_dimension_numbers<[1], [0], [0], [1], [0, 0, 1, 1], [], []>} : vector<24x32xbf16>, vector<32x32xbf16>, vector<24x32xf32> -> vector<24x32xf32>
    %20 = arith.addf %15, %19 : vector<24x32xf32>
    %c0_17 = arith.constant 0 : index
    %c7 = arith.constant 7 : index
    %c0_18 = arith.constant 0 : index
    %21 = vector.load %arg1[%c0_17, %c7, %c0_18] : memref<1x42x32xbf16, #tpu.memory_space<vmem>>, vector<1x24x32xbf16>
    %22 = vector.shape_cast %21 : vector<1x24x32xbf16> to vector<24x32xbf16>
    %c128 = arith.constant 128 : index
    %c0_19 = arith.constant 0 : index
    %23 = vector.load %arg2[%c128, %c0_19] : memref<288x32xbf16, #tpu.memory_space<vmem>>, vector<32x32xbf16>
    %cst_20 = arith.constant dense<0.000000e+00> : vector<24x32xf32>
    %24 = tpu.matmul %22, %23, %cst_20 {dimension_numbers = #tpu.dot_dimension_numbers<[1], [0], [0], [1], [0, 0, 1, 1], [], []>} : vector<24x32xbf16>, vector<32x32xbf16>, vector<24x32xf32> -> vector<24x32xf32>
    %25 = arith.addf %20, %24 : vector<24x32xf32>
    %c0_21 = arith.constant 0 : index
    %c8 = arith.constant 8 : index
    %c0_22 = arith.constant 0 : index
    %26 = vector.load %arg1[%c0_21, %c8, %c0_22] : memref<1x42x32xbf16, #tpu.memory_space<vmem>>, vector<1x24x32xbf16>
    %27 = vector.shape_cast %26 : vector<1x24x32xbf16> to vector<24x32xbf16>
    %c160 = arith.constant 160 : index
    %c0_23 = arith.constant 0 : index
    %28 = vector.load %arg2[%c160, %c0_23] : memref<288x32xbf16, #tpu.memory_space<vmem>>, vector<32x32xbf16>
    %cst_24 = arith.constant dense<0.000000e+00> : vector<24x32xf32>
    %29 = tpu.matmul %27, %28, %cst_24 {dimension_numbers = #tpu.dot_dimension_numbers<[1], [0], [0], [1], [0, 0, 1, 1], [], []>} : vector<24x32xbf16>, vector<32x32xbf16>, vector<24x32xf32> -> vector<24x32xf32>
    %30 = arith.addf %25, %29 : vector<24x32xf32>
    %c0_25 = arith.constant 0 : index
    %c12 = arith.constant 12 : index
    %c0_26 = arith.constant 0 : index
    %31 = vector.load %arg1[%c0_25, %c12, %c0_26] : memref<1x42x32xbf16, #tpu.memory_space<vmem>>, vector<1x24x32xbf16>
    %32 = vector.shape_cast %31 : vector<1x24x32xbf16> to vector<24x32xbf16>
    %c192 = arith.constant 192 : index
    %c0_27 = arith.constant 0 : index
    %33 = vector.load %arg2[%c192, %c0_27] : memref<288x32xbf16, #tpu.memory_space<vmem>>, vector<32x32xbf16>
    %cst_28 = arith.constant dense<0.000000e+00> : vector<24x32xf32>
    %34 = tpu.matmul %32, %33, %cst_28 {dimension_numbers = #tpu.dot_dimension_numbers<[1], [0], [0], [1], [0, 0, 1, 1], [], []>} : vector<24x32xbf16>, vector<32x32xbf16>, vector<24x32xf32> -> vector<24x32xf32>
    %35 = arith.addf %30, %34 : vector<24x32xf32>
    %c0_29 = arith.constant 0 : index
    %c13 = arith.constant 13 : index
    %c0_30 = arith.constant 0 : index
    %36 = vector.load %arg1[%c0_29, %c13, %c0_30] : memref<1x42x32xbf16, #tpu.memory_space<vmem>>, vector<1x24x32xbf16>
    %37 = vector.shape_cast %36 : vector<1x24x32xbf16> to vector<24x32xbf16>
    %c224 = arith.constant 224 : index
    %c0_31 = arith.constant 0 : index
    %38 = vector.load %arg2[%c224, %c0_31] : memref<288x32xbf16, #tpu.memory_space<vmem>>, vector<32x32xbf16>
    %cst_32 = arith.constant dense<0.000000e+00> : vector<24x32xf32>
    %39 = tpu.matmul %37, %38, %cst_32 {dimension_numbers = #tpu.dot_dimension_numbers<[1], [0], [0], [1], [0, 0, 1, 1], [], []>} : vector<24x32xbf16>, vector<32x32xbf16>, vector<24x32xf32> -> vector<24x32xf32>
    %40 = arith.addf %35, %39 : vector<24x32xf32>
    %c0_33 = arith.constant 0 : index
    %c14 = arith.constant 14 : index
    %c0_34 = arith.constant 0 : index
    %41 = vector.load %arg1[%c0_33, %c14, %c0_34] : memref<1x42x32xbf16, #tpu.memory_space<vmem>>, vector<1x24x32xbf16>
    %42 = vector.shape_cast %41 : vector<1x24x32xbf16> to vector<24x32xbf16>
    %c256 = arith.constant 256 : index
    %c0_35 = arith.constant 0 : index
    %43 = vector.load %arg2[%c256, %c0_35] : memref<288x32xbf16, #tpu.memory_space<vmem>>, vector<32x32xbf16>
    %cst_36 = arith.constant dense<0.000000e+00> : vector<24x32xf32>
    %44 = tpu.matmul %42, %43, %cst_36 {dimension_numbers = #tpu.dot_dimension_numbers<[1], [0], [0], [1], [0, 0, 1, 1], [], []>} : vector<24x32xbf16>, vector<32x32xbf16>, vector<24x32xf32> -> vector<24x32xf32>
    %45 = arith.addf %40, %44 : vector<24x32xf32>
    %c0_37 = arith.constant 0 : index
    %c0_38 = arith.constant 0 : index
    %46 = vector.load %arg3[%c0_37, %c0_38] : memref<1x32xf32, #tpu.memory_space<vmem>>, vector<1x32xf32>
    %47 = vector.broadcast %46 : vector<1x32xf32> to vector<24x32xf32>
    %48 = arith.addf %45, %47 : vector<24x32xf32>
    %cst_39 = arith.constant 0.000000e+00 : f32
    %49 = vector.broadcast %cst_39 : f32 to vector<24x32xf32>
    %50 = arith.maximumf %48, %49 : vector<24x32xf32>
    %51 = arith.truncf %50 : vector<24x32xf32> to vector<24x32xbf16>
    %c0_40 = arith.constant 0 : index
    %c0_41 = arith.constant 0 : index
    %52 = vector.load %arg4[%c0_40, %c0_41] : memref<32x128xbf16, #tpu.memory_space<vmem>>, vector<32x128xbf16>
    %cst_42 = arith.constant dense<0.000000e+00> : vector<24x128xf32>
    %53 = tpu.matmul %51, %52, %cst_42 {dimension_numbers = #tpu.dot_dimension_numbers<[1], [0], [0], [1], [0, 0, 1, 1], [], []>} : vector<24x32xbf16>, vector<32x128xbf16>, vector<24x128xf32> -> vector<24x128xf32>
    %c0_43 = arith.constant 0 : index
    %c0_44 = arith.constant 0 : index
    %54 = vector.load %arg5[%c0_43, %c0_44] : memref<1x128xf32, #tpu.memory_space<vmem>>, vector<1x128xf32>
    %55 = vector.broadcast %54 : vector<1x128xf32> to vector<24x128xf32>
    %56 = arith.addf %53, %55 : vector<24x128xf32>
    %c0_45 = arith.constant 0 : index
    %c0_46 = arith.constant 0 : index
    %c0_47 = arith.constant 0 : index
    %57 = vector.load %arg6[%c0_45, %c0_46, %c0_47] : memref<1x24x128xf32, #tpu.memory_space<vmem>>, vector<1x24x128xf32>
    %58 = vector.shape_cast %57 : vector<1x24x128xf32> to vector<24x128xf32>
    %59 = vector.shape_cast %56 : vector<24x128xf32> to vector<1x24x128xf32>
    tpu.vector_store %arg6[%c0_45, %c0_46, %c0_47], %59 {strides = array<i32>} : memref<1x24x128xf32, #tpu.memory_space<vmem>>, vector<1x24x128xf32>,
    return
  }
  func.func @transform_0(%arg0: i32) -> (i32, i32, i32) {
    %c0_i32 = arith.constant 0 : i32
    %c0_i32_0 = arith.constant 0 : i32
    %c0_i32_1 = arith.constant 0 : i32
    return %arg0, %c0_i32, %c0_i32_0 : i32, i32, i32
  }
  func.func @transform_1(%arg0: i32) -> (i32, i32) {
    %c0_i32 = arith.constant 0 : i32
    %c0_i32_0 = arith.constant 0 : i32
    %c0_i32_1 = arith.constant 0 : i32
    return %c0_i32, %c0_i32_0 : i32, i32
  }
  func.func @transform_2(%arg0: i32) -> (i32, i32) {
    %c0_i32 = arith.constant 0 : i32
    %c0_i32_0 = arith.constant 0 : i32
    %c0_i32_1 = arith.constant 0 : i32
    return %c0_i32, %c0_i32_0 : i32, i32
  }
  func.func @transform_3(%arg0: i32) -> (i32, i32) {
    %c0_i32 = arith.constant 0 : i32
    %c0_i32_0 = arith.constant 0 : i32
    %c0_i32_1 = arith.constant 0 : i32
    return %c0_i32, %c0_i32_0 : i32, i32
  }
  func.func @transform_4(%arg0: i32) -> (i32, i32) {
    %c0_i32 = arith.constant 0 : i32
    %c0_i32_0 = arith.constant 0 : i32
    %c0_i32_1 = arith.constant 0 : i32
    return %c0_i32, %c0_i32_0 : i32, i32
  }
  func.func @transform_5(%arg0: i32) -> (i32, i32, i32) {
    %c0_i32 = arith.constant 0 : i32
    %c0_i32_0 = arith.constant 0 : i32
    %c0_i32_1 = arith.constant 0 : i32
    return %arg0, %c0_i32, %c0_i32_0 : i32, i32, i32
  }
}

module attributes {stable_mosaic.version = 11 : i64} {
  func.func @_upsample_kernel(%arg0: i32, %arg1: i32, %arg2: memref<1x1x4x4xf32, #tpu.memory_space<vmem>>, %arg3: memref<16x4xf32, #tpu.memory_space<vmem>>, %arg4: memref<4x16xf32, #tpu.memory_space<vmem>>, %arg5: memref<1x1x16x16xf32, #tpu.memory_space<vmem>>) attributes {dimension_semantics = [#tpu.dimension_semantics<parallel>, #tpu.dimension_semantics<parallel>], iteration_bounds = array<i64: 2, 23>, scalar_prefetch = 0 : i64, scratch_operands = 0 : i64, tpu.core_type = #tpu.core_type<tc>, window_params = [{transform_indices = @transform_0, window_bounds = array<i64: 1, 1, 4, 4>}, {pipeline_mode = #tpu.pipeline_mode<synchronous>, transform_indices = @transform_1, window_bounds = array<i64: 16, 4>}, {pipeline_mode = #tpu.pipeline_mode<synchronous>, transform_indices = @transform_2, window_bounds = array<i64: 4, 16>}, {transform_indices = @transform_3, window_bounds = array<i64: 1, 1, 16, 16>}]} {
    %c0 = arith.constant 0 : index
    %c0_0 = arith.constant 0 : index
    %c0_1 = arith.constant 0 : index
    %c0_2 = arith.constant 0 : index
    %0 = vector.load %arg2[%c0, %c0_0, %c0_1, %c0_2] : memref<1x1x4x4xf32, #tpu.memory_space<vmem>>, vector<1x1x4x4xf32>
    %1 = vector.shape_cast %0 : vector<1x1x4x4xf32> to vector<4x4xf32>
    %c0_3 = arith.constant 0 : index
    %c0_4 = arith.constant 0 : index
    %2 = vector.load %arg3[%c0_3, %c0_4] : memref<16x4xf32, #tpu.memory_space<vmem>>, vector<16x4xf32>
    %cst = arith.constant dense<0.000000e+00> : vector<16x4xf32>
    %3 = tpu.matmul %2, %1, %cst {dimension_numbers = #tpu.dot_dimension_numbers<[1], [0], [0], [1], [0, 0, 1, 1], [], []>} : vector<16x4xf32>, vector<4x4xf32>, vector<16x4xf32> -> vector<16x4xf32>
    %c0_5 = arith.constant 0 : index
    %c0_6 = arith.constant 0 : index
    %4 = vector.load %arg4[%c0_5, %c0_6] : memref<4x16xf32, #tpu.memory_space<vmem>>, vector<4x16xf32>
    %cst_7 = arith.constant dense<0.000000e+00> : vector<16x16xf32>
    %5 = tpu.matmul %3, %4, %cst_7 {dimension_numbers = #tpu.dot_dimension_numbers<[1], [0], [0], [1], [0, 0, 1, 1], [], []>} : vector<16x4xf32>, vector<4x16xf32>, vector<16x16xf32> -> vector<16x16xf32>
    %c0_8 = arith.constant 0 : index
    %c0_9 = arith.constant 0 : index
    %c0_10 = arith.constant 0 : index
    %c0_11 = arith.constant 0 : index
    %6 = vector.load %arg5[%c0_8, %c0_9, %c0_10, %c0_11] : memref<1x1x16x16xf32, #tpu.memory_space<vmem>>, vector<1x1x16x16xf32>
    %7 = vector.shape_cast %6 : vector<1x1x16x16xf32> to vector<16x16xf32>
    %8 = vector.shape_cast %5 : vector<16x16xf32> to vector<1x1x16x16xf32>
    tpu.vector_store %arg5[%c0_8, %c0_9, %c0_10, %c0_11], %8 {strides = array<i32>} : memref<1x1x16x16xf32, #tpu.memory_space<vmem>>, vector<1x1x16x16xf32>,
    return
  }
  func.func @transform_0(%arg0: i32, %arg1: i32) -> (i32, i32, i32, i32) {
    %c0_i32 = arith.constant 0 : i32
    %c0_i32_0 = arith.constant 0 : i32
    %c0_i32_1 = arith.constant 0 : i32
    return %arg0, %arg1, %c0_i32, %c0_i32_0 : i32, i32, i32, i32
  }
  func.func @transform_1(%arg0: i32, %arg1: i32) -> (i32, i32) {
    %c0_i32 = arith.constant 0 : i32
    %c0_i32_0 = arith.constant 0 : i32
    %c0_i32_1 = arith.constant 0 : i32
    return %c0_i32, %c0_i32_0 : i32, i32
  }
  func.func @transform_2(%arg0: i32, %arg1: i32) -> (i32, i32) {
    %c0_i32 = arith.constant 0 : i32
    %c0_i32_0 = arith.constant 0 : i32
    %c0_i32_1 = arith.constant 0 : i32
    return %c0_i32, %c0_i32_0 : i32, i32
  }
  func.func @transform_3(%arg0: i32, %arg1: i32) -> (i32, i32, i32, i32) {
    %c0_i32 = arith.constant 0 : i32
    %c0_i32_0 = arith.constant 0 : i32
    %c0_i32_1 = arith.constant 0 : i32
    return %arg0, %arg1, %c0_i32, %c0_i32_0 : i32, i32, i32, i32
  }
}

</mosaic_0001>

<bundles_post_ra>
// kernel: tile.8
= control target key start
LH: loop header
LB: loop body
LE: loop exit
PB: predicated region body
PF: predicated region fallthrough
CT: control target
= control target key end

     0   :  { %s28_s0 = inlined_call_operand.vmem [shape: f32[3], index: 0, kind: input, shape index: {}]   ;;  %s29_s1 = inlined_call_operand.vmem [shape: f32[9,3], index: 1, kind: output, shape index: {}]  }
   0x1   :  { %v4_v0 = vld [vmem:[%s28_s0] ss:$0 sm:$0xff] }
   0x2   :  { %5 = vst [vmem:[%s29_s1] sm:$0xff] %v4_v0  ;;  %8 = vst [vmem:[%s29_s1 + $0x8] sm:$0xff] %v4_v0 }

// kernel: mul.5
= control target key start
LH: loop header
LB: loop body
LE: loop exit
PB: predicated region body
PF: predicated region fallthrough
CT: control target
= control target key end

     0   :  { %s75_s10 = smov 24   ;;  %s76_s11 = smov 18   ;;  %vm3_vm0 = vcmask 23552   ;;  %vm9_vm1 = vcmask 220352   ;;  %vm15_vm2 = vcmask 195752   ;;  %vm21_vm3 = vcmask 171152   ;;  %s123_s0 = inlined_call_operand.vmem [shape: f32[9,3], index: 0, kind: input, shape index: {}]   ;;  %s124_s1 = inlined_call_operand.vmem [shape: f32[27], index: 1, kind: output, shape index: {}]  }
   0x1   :  { %v59_v0 = vld [vmem:[%s123_s0 + $0x8] sm:$0x1]   ;;  %v61_v1 = vld [vmem:[%s123_s0 + $0x6] sm:$0x1]   ;;  %v60_v2 = vld [vmem:[%s123_s0 + $0x7] sm:$0x1]  }
   0x2   :  { %7 = vrot.lane.b32.xlu0 %v59_v0, %s75_s10  ;;  %19 = vrot.lane.b32.xlu1 %v61_v1, %s76_s11  ;;  %v62_v3 = vld [vmem:[%s123_s0 + $0x5] sm:$0x1]   ;;  %v2_v4 = vld [vmem:[%s123_s0] sm:$0x1]   ;;  %s77_s18 = smov 21   ;;  %s78_s19 = smov 15  }
   0x3   :  { %4 = vst.msk [vmem:[#allocation0] sm:$0x1] %vm3_vm0, %v2_v4   ;;  %v63_v5 = vld [vmem:[%s123_s0 + $0x4] sm:$0x1]   ;;  %v64_v6 = vld [vmem:[%s123_s0 + $0x3] sm:$0x1]  }
   0x4   :  { %s79_s24 = smov 12   ;;  %s80_s25 = smov 9   ;;  %v65_v7 = vld [vmem:[%s123_s0 + $0x2] sm:$0x1]   ;;  %v66_v8 = vld [vmem:[%s123_s0 + $0x1] sm:$0x1]  }
   0x5   :  { %s81_s0 = smov 6   ;;  %s82_s30 = smov 3   ;;  %vm27_vm4 = vcmask 146552   ;;  %vm33_vm5 = vcmask 121952   ;;  %vm39_vm6 = vcmask 97352   ;;  %vm45_vm7 = vcmask 72752  }
   0x6   :  { %13 = vrot.lane.b32.xlu0 %v60_v2, %s77_s18  ;;  %25 = vrot.lane.b32.xlu1 %v62_v3, %s78_s19  ;;  %vm51_vm8 = vcmask 48152  }
   0xa   :  { %31 = vrot.lane.b32.xlu0 %v63_v5, %s79_s24  ;;  %37 = vrot.lane.b32.xlu1 %v64_v6, %s80_s25 }
   0xe   :  { %43 = vrot.lane.b32.xlu0 %v65_v7, %s81_s0  ;;  %49 = vrot.lane.b32.xlu1 %v66_v8, %s82_s30 }
  0x74   :  { %v8_v9 = vpop.permute.xlu0 %7   ;;  %v20_v10 = vpop.permute.xlu1 %19  }
  0x75   :  { %10 = vst.msk [vmem:[#allocation0] sm:$0x1] %vm9_vm1, %v8_v9  }
  0x78   :  { %v14_v11 = vpop.permute.xlu0 %13   ;;  %v26_v12 = vpop.permute.xlu1 %25  }
  0x79   :  { %16 = vst.msk [vmem:[#allocation0] sm:$0x1] %vm15_vm2, %v14_v11  }
  0x7a   :  { %22 = vst.msk [vmem:[#allocation0] sm:$0x1] %vm21_vm3, %v20_v10  }
  0x7b   :  { %28 = vst.msk [vmem:[#allocation0] sm:$0x1] %vm27_vm4, %v26_v12  }
  0x7c   :  { %v32_v13 = vpop.permute.xlu0 %31   ;;  %v38_v14 = vpop.permute.xlu1 %37  }
  0x7d   :  { %34 = vst.msk [vmem:[#allocation0] sm:$0x1] %vm33_vm5, %v32_v13  }
  0x7e   :  { %40 = vst.msk [vmem:[#allocation0] sm:$0x1] %vm39_vm6, %v38_v14  }
  0x80   :  { %v44_v15 = vpop.permute.xlu0 %43   ;;  %v50_v16 = vpop.permute.xlu1 %49  }
  0x81   :  { %46 = vst.msk [vmem:[#allocation0] sm:$0x1] %vm45_vm7, %v44_v15  }
  0x82   :  { %52 = vst.msk [vmem:[#allocation0] sm:$0x1] %vm51_vm8, %v50_v16  }
  0x89   :  { %v56_v17 = vld [vmem:[#allocation0] sm:$0x1] }
  0x8a   :  { %58 = vst [vmem:[%s124_s1] sm:$0x1] %v56_v17 }

// kernel: segmentation_nn_forward.4
= control target key start
LH: loop header
LB: loop body
LE: loop exit
PB: predicated region body
PF: predicated region fallthrough
CT: control target
= control target key end

     0   :  { %vm118_vm0 = vcmask 1044480   ;;  %vm119_vm1 = vcmask 1045504   ;;  %vm93_vm2 = vcmask 220160   ;;  %v419_v1 = vmov 65535   ;;  %s545_s1 = inlined_call_operand.vmem [shape: bf16[27,16], index: 1, kind: input, shape index: {}]   ;;  %s546_s0 = inlined_call_operand.vmem [shape: bf16[128,27], index: 0, kind: input, shape index: {}]   ;;  %s547_s2 = inlined_call_operand.vmem [shape: f32[1,16], index: 2, kind: input, shape index: {}]   ;;  %s548_s3 = inlined_call_operand.vmem [shape: bf16[128,16], index: 3, kind: output, shape index: {}]  }
   0x1   :  { %v409_v0 = vld [vmem:[%s545_s1] sm:$0xff]   ;;  %v120_v2 = vsel %vm118_vm0, 4294967295, %v419_v1  ;;  %v410_v3 = vld [vmem:[%s545_s1 + $0x8] sm:$0x3f]   ;;  %v415_v10 = vld [vmem:[%s546_s0 + $0x10] sm:$0xff]   ;;  %vm302_vm3 = vcmask 125952  }
   0x2   :  { %384 = vmatprep.subr.bf16.mxu0 %v409_v0  ;;  %404 = vmatprep.subr.bf16.mxu1 %v409_v0  ;;  %v121_v4 = vsel %vm119_vm1, %v120_v2, 0  ;;  %v411_v5 = vld [vmem:[%s546_s0] sm:$0xff]   ;;  %v413_v8 = vld [vmem:[%s546_s0 + $0x8] sm:$0xff]   ;;  %v416_v11 = vld [vmem:[%s546_s0 + $0x30] sm:$0xff]  }
   0x3   :  { %385 = vmatpush3.bf16.msra.mxu0 %v409_v0  ;;  %406 = vmatpush3.bf16.msra.mxu1 %v409_v0  ;;  %v123_v6 = vand.u32 %v410_v3, %v121_v4  ;;  %v412_v7 = vld [vmem:[%s546_s0 + $0x20] sm:$0xff]   ;;  %v414_v9 = vld [vmem:[%s546_s0 + $0x28] sm:$0xff]   ;;  %v417_v12 = vld [vmem:[%s546_s0 + $0x18] sm:$0xff]  }
   0x4   :  { %388 = vmatprep.mubr.msk.bf16.mxu0 %vm93_vm2, %v411_v5  ;;  %396 = vmatprep.mubr.msk.bf16.mxu1 %vm93_vm2, %v412_v7  ;;  %v418_v13 = vld [vmem:[%s546_s0 + $0x38] sm:$0xff]   ;;  %v323_v14 = vld [vmem:[%s547_s2] ss:$0 sm:$0xff] }
   0x5   :  { %386 = vmatprep.subr.bf16.mxu0 %v123_v6  ;;  %405 = vmatprep.subr.bf16.mxu1 %v123_v6 }
   0x7   :  { %387 = vmatpush3.bf16.msra.mxu0 %v123_v6  ;;  %407 = vmatpush3.bf16.msra.mxu1 %v123_v6 }
   0xa   :  { %389 = vmatmul.mubr.msk.bf16.vlgmr.msra.gmra.mrb[0].mxu0 %vm93_vm2, %v413_v8  ;;  %397 = vmatmul.mubr.msk.bf16.vlgmr.msra.gmra.mrb[0].mxu1 %vm93_vm2, %v414_v9 }
   0xb   :  { %392 = vmatprep.mubr.msk.bf16.mxu0 %vm93_vm2, %v415_v10  ;;  %400 = vmatprep.mubr.msk.bf16.mxu1 %vm93_vm2, %v416_v11 }
  0x12   :  { %393 = vmatmul.mubr.msk.bf16.gmra.mrb[4].mxu0 %vm93_vm2, %v417_v12  ;;  %401 = vmatmul.mubr.msk.bf16.gmra.mrb[4].mxu1 %vm93_vm2, %v418_v13 }
  0xdd   :  { %v390_v15 = vpop.f32.mrb[0].mxu0  ;;  %v398_v16 = vpop.f32.mrb[0].mxu1 }
  0xde   :  { %v168_v17 = vadd.f32 %v390_v15, %v323_v14  ;;  %v200_v18 = vadd.f32 %v398_v16, %v323_v14  ;;  %v159_v19 = vpop.f32.mrb[1].mxu0  ;;  %v191_v20 = vpop.f32.mrb[1].mxu1 }
  0xdf   :  { %v160_v21 = vadd.f32 %v323_v14, %v159_v19  ;;  %v192_v22 = vadd.f32 %v323_v14, %v191_v20  ;;  %v391_v23 = vpop.f32.mrb[2].mxu0  ;;  %v399_v24 = vpop.f32.mrb[2].mxu1 }
  0xe0   :  { %v224_v25 = vmax.f32 %v168_v17, 0.0  ;;  %v232_v26 = vmax.f32 %v200_v18, 0.0  ;;  %v171_v27 = vadd.f32 %v391_v23, %v323_v14  ;;  %v203_v28 = vadd.f32 %v399_v24, %v323_v14  ;;  %v162_v29 = vpop.f32.mrb[3].mxu0  ;;  %v194_v30 = vpop.f32.mrb[3].mxu1 }
  0xe1   :  { %v222_v31 = vmax.f32 %v160_v21, 0.0  ;;  %v230_v32 = vmax.f32 %v192_v22, 0.0  ;;  %v163_v33 = vadd.f32 %v323_v14, %v162_v29  ;;  %v195_v34 = vadd.f32 %v323_v14, %v194_v30 }
  0xe2   :  { %v360_v35 = vpack.c.bf16 %v224_v25, %v224_v25  ;;  %v368_v36 = vpack.c.bf16 %v232_v26, %v232_v26  ;;  %v225_v37 = vmax.f32 %v171_v27, 0.0  ;;  %v233_v38 = vmax.f32 %v203_v28, 0.0 }
  0xe3   :  { %v358_v39 = vpack.c.bf16 %v222_v31, %v222_v31  ;;  %v366_v40 = vpack.c.bf16 %v230_v32, %v230_v32  ;;  %v223_v41 = vmax.f32 %v163_v33, 0.0  ;;  %v231_v42 = vmax.f32 %v195_v34, 0.0 }
  0xe4   :  { %305 = vst.msk [vmem:[%s548_s3 + $0x8] sm:$0xf] %vm302_vm3, %v360_v35  ;;  %313 = vst.msk [vmem:[%s548_s3 + $0x28] sm:$0xf] %vm302_vm3, %v368_v36  ;;  %v361_v43 = vpack.c.bf16 %v225_v37, %v225_v37  ;;  %v369_v44 = vpack.c.bf16 %v233_v38, %v233_v38 }
  0xe5   :  { %303 = vst.msk [vmem:[%s548_s3] sm:$0xf] %vm302_vm3, %v358_v39  ;;  %311 = vst.msk [vmem:[%s548_s3 + $0x20] sm:$0xf] %vm302_vm3, %v366_v40  ;;  %v359_v45 = vpack.c.bf16 %v223_v41, %v223_v41  ;;  %v367_v46 = vpack.c.bf16 %v231_v42, %v231_v42  ;;  %v394_v47 = vpop.f32.mrb[4].mxu0  ;;  %v402_v48 = vpop.f32.mrb[4].mxu1 }
  0xe6   :  { %306 = vst.msk [vmem:[%s548_s3 + $0xc] sm:$0xf] %vm302_vm3, %v361_v43  ;;  %314 = vst.msk [vmem:[%s548_s3 + $0x2c] sm:$0xf] %vm302_vm3, %v369_v44  ;;  %v184_v49 = vadd.f32 %v394_v47, %v323_v14  ;;  %v216_v50 = vadd.f32 %v402_v48, %v323_v14  ;;  %v175_v51 = vpop.f32.mrb[5].mxu0  ;;  %v207_v52 = vpop.f32.mrb[5].mxu1 }
  0xe7   :  { %304 = vst.msk [vmem:[%s548_s3 + $0x4] sm:$0xf] %vm302_vm3, %v359_v45  ;;  %312 = vst.msk [vmem:[%s548_s3 + $0x24] sm:$0xf] %vm302_vm3, %v367_v46  ;;  %v176_v53 = vadd.f32 %v323_v14, %v175_v51  ;;  %v208_v54 = vadd.f32 %v323_v14, %v207_v52  ;;  %v395_v55 = vpop.f32.mrb[6].mxu0  ;;  %v403_v56 = vpop.f32.mrb[6].mxu1 }
  0xe8   :  { %v228_v57 = vmax.f32 %v184_v49, 0.0  ;;  %v236_v58 = vmax.f32 %v216_v50, 0.0  ;;  %v187_v59 = vadd.f32 %v395_v55, %v323_v14  ;;  %v219_v60 = vadd.f32 %v403_v56, %v323_v14  ;;  %v178_v61 = vpop.f32.mrb[7].mxu0  ;;  %v210_v62 = vpop.f32.mrb[7].mxu1 }
  0xe9   :  { %v226_v63 = vmax.f32 %v176_v53, 0.0  ;;  %v234_v0 = vmax.f32 %v208_v54, 0.0  ;;  %v179_v1 = vadd.f32 %v323_v14, %v178_v61  ;;  %v211_v2 = vadd.f32 %v323_v14, %v210_v62 }
  0xea   :  { %v364_v3 = vpack.c.bf16 %v228_v57, %v228_v57  ;;  %v372_v4 = vpack.c.bf16 %v236_v58, %v236_v58  ;;  %v229_v5 = vmax.f32 %v187_v59, 0.0  ;;  %v237_v6 = vmax.f32 %v219_v60, 0.0 }
  0xeb   :  { %v362_v7 = vpack.c.bf16 %v226_v63, %v226_v63  ;;  %v370_v8 = vpack.c.bf16 %v234_v0, %v234_v0  ;;  %v227_v9 = vmax.f32 %v179_v1, 0.0  ;;  %v235_v10 = vmax.f32 %v211_v2, 0.0 }
  0xec   :  { %309 = vst.msk [vmem:[%s548_s3 + $0x18] sm:$0xf] %vm302_vm3, %v364_v3  ;;  %317 = vst.msk [vmem:[%s548_s3 + $0x38] sm:$0xf] %vm302_vm3, %v372_v4  ;;  %v365_v11 = vpack.c.bf16 %v229_v5, %v229_v5  ;;  %v373_v12 = vpack.c.bf16 %v237_v6, %v237_v6 }
  0xed   :  { %307 = vst.msk [vmem:[%s548_s3 + $0x10] sm:$0xf] %vm302_vm3, %v362_v7  ;;  %315 = vst.msk [vmem:[%s548_s3 + $0x30] sm:$0xf] %vm302_vm3, %v370_v8  ;;  %v363_v13 = vpack.c.bf16 %v227_v9, %v227_v9  ;;  %v371_v14 = vpack.c.bf16 %v235_v10, %v235_v10 }
  0xee   :  { %310 = vst.msk [vmem:[%s548_s3 + $0x1c] sm:$0xf] %vm302_vm3, %v365_v11  ;;  %318 = vst.msk [vmem:[%s548_s3 + $0x3c] sm:$0xf] %vm302_vm3, %v373_v12 }
  0xef   :  { %308 = vst.msk [vmem:[%s548_s3 + $0x14] sm:$0xf] %vm302_vm3, %v363_v13  ;;  %316 = vst.msk [vmem:[%s548_s3 + $0x34] sm:$0xf] %vm302_vm3, %v371_v14 }

// kernel: segmentation_nn_forward.5
= control target key start
LH: loop header
LB: loop body
LE: loop exit
PB: predicated region body
PF: predicated region fallthrough
CT: control target
= control target key end

     0   :  { %v351_v0 = vmov 0   ;;  %vm122_vm0 = vcmask 130048   ;;  %vm207_vm1 = vcmask 261120   ;;  %vm283_vm2 = vcmask 257024   ;;  %s447_s1 = inlined_call_operand.vmem [shape: bf16[144,32], index: 1, kind: input, shape index: {}]   ;;  %s448_s0 = inlined_call_operand.vmem [shape: bf16[32,144], index: 0, kind: input, shape index: {}]   ;;  %s449_s3 = inlined_call_operand.vmem [shape: bf16[32,32], index: 3, kind: input, shape index: {}]   ;;  %s450_s2 = inlined_call_operand.vmem [shape: f32[1,32], index: 2, kind: input, shape index: {}]   ;;  %s451_s4 = inlined_call_operand.vmem [shape: f32[1,32], index: 4, kind: input, shape index: {}]   ;;  %s452_s5 = inlined_call_operand.vmem [shape: bf16[32,32], index: 5, kind: output, shape index: {}]  }
   0x1   :  { %129 = vmatprep.subr.bf16.mxu0 %v351_v0  ;;  %v334_v1 = vld [vmem:[%s447_s1] sm:$0xff]   ;;  %v335_v2 = vld [vmem:[%s447_s1 + $0x8] sm:$0xff]   ;;  %v336_v3 = vld [vmem:[%s447_s1 + $0x10] sm:$0xff]  }
   0x2   :  { %130 = vmatpush1.bf16.msra.mxu0 %v334_v1  ;;  %v337_v4 = vld [vmem:[%s447_s1 + $0x18] sm:$0xff]   ;;  %v345_v5 = vld [vmem:[%s448_s0 + $0x4] ss:$8 sps:$4 sm:$0xff]   ;;  %v340_v8 = vld [vmem:[%s447_s1 + $0x30] sm:$0xff]  }
   0x3   :  { %131 = vmatprep.subr.bf16.mxu0 %v351_v0  ;;  %306 = vmatprep.mubr.msk.bf16.mxu0 %vm122_vm0, %v345_v5  ;;  %v338_v6 = vld [vmem:[%s447_s1 + $0x20] sm:$0xff]   ;;  %v339_v7 = vld [vmem:[%s447_s1 + $0x28] sm:$0xff]   ;;  %v341_v9 = vld [vmem:[%s447_s1 + $0x38] sm:$0xff]  }
   0x4   :  { %v342_v10 = vld [vmem:[%s447_s1 + $0x40] sm:$0xff]   ;;  %v346_v12 = vld [vmem:[%s448_s0 + $0x14] ss:$8 sps:$4 sm:$0xff]   ;;  %v348_v13 = vld [vmem:[%s448_s0 + $0x10] ss:$8 sps:$4 sm:$0xff]  }
   0x5   :  { %v343_v11 = vld [vmem:[%s448_s0] ss:$8 sps:$4 sm:$0xff]  }
   0x6   :  { %132 = vmatpush1.bf16.msra.mxu0 %v335_v2  ;;  %v349_v14 = vld [vmem:[%s449_s3] sm:$0xff]   ;;  %v350_v15 = vld [vmem:[%s449_s3 + $0x8] sm:$0xff]  }
   0x7   :  { %133 = vmatprep.subr.bf16.mxu0 %v351_v0  ;;  %325 = vmatprep.subr.bf16.mxu1 %v349_v14  ;;  %v292_v16 = vld [vmem:[%s450_s2] ss:$0 sm:$0xff] }
   0x8   :  { %326 = vmatpush3.bf16.msra.mxu1 %v349_v14  ;;  %v308_v35 = vld [vmem:[%s451_s4] ss:$0 sm:$0xff] }
   0x9   :  { %327 = vmatprep.subr.bf16.mxu1 %v350_v15 }
   0xa   :  { %134 = vmatpush1.bf16.msra.mxu0 %v336_v3 }
   0xb   :  { %135 = vmatprep.subr.bf16.mxu0 %v351_v0 }
   0xc   :  { %328 = vmatpush3.bf16.msra.mxu1 %v350_v15 }
   0xe   :  { %136 = vmatpush1.bf16.msra.mxu0 %v337_v4 }
   0xf   :  { %137 = vmatprep.subr.bf16.mxu0 %v351_v0 }
  0x12   :  { %138 = vmatpush1.bf16.msra.mxu0 %v338_v6 }
  0x13   :  { %139 = vmatprep.subr.bf16.mxu0 %v351_v0 }
  0x16   :  { %140 = vmatpush1.bf16.msra.mxu0 %v339_v7 }
  0x17   :  { %141 = vmatprep.subr.bf16.mxu0 %v351_v0 }
  0x1a   :  { %142 = vmatpush1.bf16.msra.mxu0 %v340_v8 }
  0x1b   :  { %143 = vmatprep.subr.bf16.mxu0 %v351_v0 }
  0x1e   :  { %144 = vmatpush1.bf16.msra.mxu0 %v341_v9 }
  0x1f   :  { %145 = vmatprep.subr.bf16.mxu0 %v351_v0 }
  0x22   :  { %146 = vmatpush1.bf16.msra.mxu0 %v342_v10 }
  0x25   :  { %162 = vmatmul.mubr.bf16.vlgmr.msra.gmra.mrb[0].mxu0 %v343_v11 }
  0x26   :  { %307 = vmatprep.mubr.msk.bf16.mxu0 %vm122_vm0, %v346_v12 }
  0x2d   :  { %170 = vmatmul.mubr.bf16.gmra.mrb[4].mxu0 %v348_v13 }
  0xf8   :  { %v163_v17 = vpop.f32.mrb[0].mxu0 }
  0xf9   :  { %v164_v18 = vadd.f32 %v292_v16, %v163_v17  ;;  %v165_v19 = vpop.f32.mrb[1].mxu0 }
  0xfa   :  { %v166_v20 = vpop.f32.mrb[2].mxu0 }
  0xfb   :  { %v167_v21 = vadd.f32 %v292_v16, %v166_v20  ;;  %v168_v22 = vpop.f32.mrb[3].mxu0  ;;  %v178_v23 = vmax.f32 %v164_v18, 0.0 }
  0xfd   :  { %v179_v24 = vmax.f32 %v167_v21, 0.0 }
  0xff   :  { %v182_v25 = vpack.c.bf16 %v179_v24, %v178_v23 }
 0x100   :  { %v171_v26 = vpop.f32.mrb[4].mxu0 }
 0x101   :  { %v172_v27 = vadd.f32 %v292_v16, %v171_v26  ;;  %v173_v28 = vpop.f32.mrb[5].mxu0  ;;  %329 = vmatprep.mubr.msk.bf16.mxu1 %vm207_vm1, %v182_v25 }
 0x102   :  { %v174_v29 = vpop.f32.mrb[6].mxu0 }
 0x103   :  { %v175_v30 = vadd.f32 %v292_v16, %v174_v29  ;;  %v176_v31 = vpop.f32.mrb[7].mxu0  ;;  %v180_v32 = vmax.f32 %v172_v27, 0.0 }
 0x105   :  { %v181_v33 = vmax.f32 %v175_v30, 0.0 }
 0x107   :  { %v183_v34 = vpack.c.bf16 %v181_v33, %v180_v32 }
 0x109   :  { %330 = vmatmul.mubr.msk.bf16.vlgmr.msra.gmra.mrb[0].mxu1 %vm207_vm1, %v183_v34 }
 0x1dc   :  { %v331_v36 = vpop.f32.mrb[0].mxu1 }
 0x1dd   :  { %v257_v37 = vadd.f32 %v331_v36, %v308_v35  ;;  %v248_v38 = vpop.f32.mrb[1].mxu1 }
 0x1de   :  { %v249_v39 = vadd.f32 %v308_v35, %v248_v38  ;;  %v332_v40 = vpop.f32.mrb[2].mxu1 }
 0x1df   :  { %v265_v41 = vmax.f32 %v257_v37, 0.0  ;;  %v260_v42 = vadd.f32 %v332_v40, %v308_v35  ;;  %v251_v43 = vpop.f32.mrb[3].mxu1 }
 0x1e0   :  { %v263_v44 = vmax.f32 %v249_v39, 0.0  ;;  %v252_v45 = vadd.f32 %v308_v35, %v251_v43 }
 0x1e1   :  { %v319_v46 = vpack.c.bf16 %v265_v41, %v265_v41  ;;  %v266_v47 = vmax.f32 %v260_v42, 0.0 }
 0x1e2   :  { %v317_v48 = vpack.c.bf16 %v263_v44, %v263_v44  ;;  %v264_v49 = vmax.f32 %v252_v45, 0.0 }
 0x1e3   :  { %286 = vst.msk [vmem:[%s452_s5 + $0x8] sm:$0xf] %vm283_vm2, %v319_v46  ;;  %v320_v50 = vpack.c.bf16 %v266_v47, %v266_v47 }
 0x1e4   :  { %284 = vst.msk [vmem:[%s452_s5] sm:$0xf] %vm283_vm2, %v317_v48  ;;  %v318_v51 = vpack.c.bf16 %v264_v49, %v264_v49 }
 0x1e5   :  { %287 = vst.msk [vmem:[%s452_s5 + $0xc] sm:$0xf] %vm283_vm2, %v320_v50 }
 0x1e6   :  { %285 = vst.msk [vmem:[%s452_s5 + $0x4] sm:$0xf] %vm283_vm2, %v318_v51 }

// kernel: segmentation_nn_forward.7
= control target key start
LH: loop header
LB: loop body
LE: loop exit
PB: predicated region body
PF: predicated region fallthrough
CT: control target
= control target key end

     0   :  { %s607_s12 = smov 0   ;;  %s609_s13 = smov 0   ;;  %s671_s0 = inlined_call_operand.vmem [shape: f32[2,23,4,4], index: 0, kind: input, shape index: {}]   ;;  %s672_s1 = inlined_call_operand.vmem [shape: f32[16,4], index: 1, kind: input, shape index: {}]   ;;  %s673_s2 = inlined_call_operand.vmem [shape: f32[4,16], index: 2, kind: input, shape index: {}]   ;;  %s674_s3 = inlined_call_operand.vmem [shape: f32[2,23,16,16], index: 3, kind: output, shape index: {}]  }
   0x1   :  { %s611_s14 = smov 0   ;;  %s613_s15 = smov 0  }
   0x2   :  { %s615_s16 = smov 0  }
   0x3 LB: > { %s22_s17 = sadd.s32 1, %s577_s14  ;;  %s25_s18 = sadd.s32 1, %s581_s15  ;;  %s585_s16 = sphi %s615_s16, %s13_s16   ;;  %s581_s15 = sphi %s613_s15, %s678_s15   ;;  %s577_s14 = sphi %s611_s14, %s677_s14   ;;  %s573_s13 = sphi %s609_s13, %s676_s13   ;;  %s569_s12 = sphi %s607_s12, %s675_s12  }
   0x4   : > { %p23_p0 = scmp.ge.s32.totalorder %s22_s17, 23  ;;  %p477_p1 = scmp.ge.s32.totalorder %s585_s16, 1 }
   0x5   : > { %p156_p2 = scmp.lt.s32.totalorder %s585_s16, 47 }
   0x6   : > { %s680_s17 = smov (%p23_p0, %s22_s17), 0  ;;  %s682_s18 = smov (!%p23_p0, %s25_s18), %s581_s15 }
   0x7   : > { %p157_p3 = pnand %p477_p1, %p156_p2  ;;  %p27_p4 = scmp.ge.s32.totalorder %s682_s18, 2 }
   0x8   : > { %p187_p5 = scmp.lt.s32.totalorder (!%p157_p3), %s573_s13, 1  ;;  %p189_p6 = scmp.lt.s32.totalorder (!%p157_p3), %s569_s12, 22  ;;  %v205_v0 = vld [vmem:[%s672_s1] sm:$0xff] (!%p157_p3)  ;;  %vm207_vm0 = vcmask (!%p157_p3), 31744   ;;  %vm214_vm1 = vcmask (!%p157_p3), 1043456   ;;  %v206_v2 = vld [vmem:[%s672_s1 + $0x8] sm:$0xff] (!%p157_p3) }
   0x9   : > { %s684_s18 = smov (%p27_p4, %s682_s18), 0  ;;  %160 = sbr.rel (%p157_p3) target bundleno = 453 (0x1c5), region = 32 }
   0xa   : > { %497 = vmatprep.mubr.msk.f32.mxu0 (!%p157_p3), %vm207_vm0, %v205_v0  ;;  %v293_v3 = vld [vmem:[%s673_s2] sm:$0xf] (!%p157_p3)  ;;  %vm378_vm2 = vcmask (!%p157_p3), 130048  }
   0xb   : > { %500 = vmatprep.subr.msk.mxu1 (!%p157_p3), %vm214_vm1, %v293_v3 }
   0xc   : > { %501 = vmatpush3.msk.msra.mxu1 (!%p157_p3), %vm214_vm1, %v293_v3 }
  0x10   : > { %s686_s13 = smov (!%p187_p5, %s573_s13), 1  ;;  %s688_s12 = smov (!%p189_p6, %s569_s12), 22 }
  0x11   : > { %s505_s21 = smul.u32 23, %s686_s13  ;;  %s479_s5 = sshll.u32 %s688_s12, 1 }
  0x12   : > { %s506_s4 = smul.u32 46, %s686_s13 }
  0x13   : > { %s192_s22 = sadd.s32 %s505_s21, %s688_s12 }
  0x14   : > { %s478_s23 = sshll.u32 %s192_s22, 2  ;;  %s201_s6 = sadd.s32 %s506_s4, %s479_s5 }
  0x15   : > { %s194_s26 = scalar_lea.vmem %s671_s0, %s478_s23  ;;  %s480_s7 = sshll.u32 %s201_s6, 3 }
  0x16   : > { %v204_v1 = vld [vmem:[%s194_s26] sm:$0xf]  ;;  %s203_s10 = scalar_lea.vmem %s674_s3, %s480_s7 }
  0x17   : > { %495 = vmatprep.subr.msk.mxu0 %vm214_vm1, %v204_v1 }
  0x18   : > { %496 = vmatpush3.msk.msra.mxu0 %vm214_vm1, %v204_v1 }
  0x19   : > { %498 = vmatmul.mubr.msk.f32.vlgmr.msra.gmra.mrb[0].mxu0 %vm207_vm0, %v206_v2 }
  0xec   : > { %v499_v4 = vpop.f32.mrb[0].mxu0 }
  0xed   : > { %v284_v5 = vpop.f32.mrb[1].mxu0 }
  0xee   : > { %502 = vmatprep.mubr.msk.f32.mxu1 %vm207_vm0, %v284_v5 }
  0xef   : > { %503 = vmatmul.mubr.msk.f32.vlgmr.msra.gmra.mrb[0].mxu1 %vm207_vm0, %v499_v4 }
 0x1c2   : > { %v504_v6 = vpop.f32.mrb[0].mxu1 }
 0x1c3   : > { %380 = vst.msk [vmem:[%s203_s10 + $0x8] sm:$0xff] %vm378_vm2, %v504_v6  ;;  %v369_v7 = vpop.f32.mrb[1].mxu1 }
 0x1c4   : > { %379 = vst.msk [vmem:[%s203_s10] sm:$0xff] %vm378_vm2, %v369_v7 }
 0x1c5 PF: > { %s13_s16 = sadd.s32 1, %s585_s16   ;;  %s675_s12 = smov %s577_s14 }
 0x1c6   : > { %p10_p7 = scmp.ge.s32.totalorder %s13_s16, 48   ;;  %s676_s13 = smov %s581_s15 }
 0x1c7   : > { %s677_s14 = smov %s680_s17  ;;  %s678_s15 = smov %s684_s18 }
 0x1c8   :  { %12 = sbr.rel (!%p10_p7) target bundleno = 3 (0x3), region = 62 }

// kernel: segmentation_nn_forward.6
= control target key start
LH: loop header
LB: loop body
LE: loop exit
PB: predicated region body
PF: predicated region fallthrough
CT: control target
= control target key end

     0   :  { %s1413_s18 = smov 0   ;;  %s1567_s0 = inlined_call_operand.vmem [shape: bf16[2,42,32], index: 0, kind: input, shape index: {}]   ;;  %s1568_s1 = inlined_call_operand.vmem [shape: bf16[288,32], index: 1, kind: input, shape index: {}]   ;;  %s1569_s2 = inlined_call_operand.vmem [shape: f32[1,32], index: 2, kind: input, shape index: {}]   ;;  %s1570_s3 = inlined_call_operand.vmem [shape: bf16[32,128], index: 3, kind: input, shape index: {}]   ;;  %s1571_s4 = inlined_call_operand.vmem [shape: f32[1,128], index: 4, kind: input, shape index: {}]   ;;  %s1572_s5 = inlined_call_operand.vmem [shape: f32[2,24,128], index: 5, kind: output, shape index: {}]  }
   0x1 LB: > { %s1149_s19 = sadd.s32 4294967295, %s1381_s18   ;;  %p1153_p0 = scmp.ge.s32.totalorder %s1381_s18, 1  ;;  %s1381_s18 = sphi %s1413_s18, %s15_s18  }
   0x2   : > { %p187_p1 = scmp.lt.s32.totalorder %s1381_s18, 3 }
   0x4   : > { %p188_p2 = pnand %p1153_p0, %p187_p1 }
   0x5   : > { %v1342_v0 = vld [vmem:[%s1568_s1 + $0x10] sm:$0xff] (!%p188_p2)   ;;  %p215_p3 = scmp.lt.s32.totalorder (!%p188_p2), %s1149_s19, 1  ;;  %v1343_v1 = vld [vmem:[%s1568_s1] sm:$0xff] (!%p188_p2)   ;;  %v1344_v2 = vld [vmem:[%s1568_s1 + $0x18] sm:$0xff] (!%p188_p2)   ;;  %vm276_vm0 = vcmask (!%p188_p2), 261120   ;;  %vm405_vm2 = vcmask (!%p188_p2), 1046528  }
   0x6   : > { %191 = sbr.rel (%p188_p2) target bundleno = 502 (0x1f6), region = 40  ;;  %1253 = vmatprep.subr.bf16.mxu0 (!%p188_p2), %v1342_v0  ;;  %1261 = vmatprep.subr.bf16.mxu1 (!%p188_p2), %v1343_v1  ;;  %v1345_v3 = vld [vmem:[%s1568_s1 + $0x8] sm:$0xff] (!%p188_p2)   ;;  %v1348_v4 = vld [vmem:[%s1568_s1 + $0x20] sm:$0xff] (!%p188_p2)   ;;  %v1350_v5 = vld [vmem:[%s1568_s1 + $0x30] sm:$0xff] (!%p188_p2)   ;;  %vm248_vm1 = vsmask.f32 (!%p188_p2), 7424 }
   0x7   : > { %1254 = vmatpush3.bf16.msra.mxu0 (!%p188_p2), %v1342_v0  ;;  %1262 = vmatpush3.bf16.msra.mxu1 (!%p188_p2), %v1343_v1  ;;  %v1352_v13 = vld [vmem:[%s1568_s1 + $0x38] sm:$0xff] (!%p188_p2)   ;;  %v1357_v28 = vld [vmem:[%s1568_s1 + $0x50] sm:$0xff] (!%p188_p2)   ;;  %vm490_vm3 = vcmask (!%p188_p2), 1044480   ;;  %v1351_v36 = vld [vmem:[%s1568_s1 + $0x28] sm:$0xff] (!%p188_p2)   ;;  %vm571_vm4 = vsmask.f32 (!%p188_p2), 4352 }
   0x8   : > { %1255 = vmatprep.subr.bf16.mxu0 (!%p188_p2), %v1344_v2  ;;  %1263 = vmatprep.subr.bf16.mxu1 (!%p188_p2), %v1345_v3  ;;  %v1359_v42 = vld [vmem:[%s1568_s1 + $0x58] sm:$0xff] (!%p188_p2)   ;;  %v1354_v46 = vld [vmem:[%s1568_s1 + $0x40] sm:$0xff] (!%p188_p2)   ;;  %v1364_v50 = vld [vmem:[%s1568_s1 + $0x70] sm:$0xff] (!%p188_p2)   ;;  %vm832_vm5 = vsmask.f32 (!%p188_p2), 5376  ;;  %vm751_vm6 = vcmask (!%p188_p2), 1045504  }
   0x9   : > { %v1358_v61 = vld [vmem:[%s1568_s1 + $0x48] sm:$0xff] (!%p188_p2)  }
   0xb   : > { %1256 = vmatpush3.bf16.msra.mxu0 (!%p188_p2), %v1344_v2  ;;  %1264 = vmatpush3.bf16.msra.mxu1 (!%p188_p2), %v1345_v3 }
   0xc   : > { %1269 = vmatprep.subr.bf16.mxu0 (!%p188_p2), %v1348_v4  ;;  %1277 = vmatprep.subr.bf16.mxu1 (!%p188_p2), %v1350_v5 }
   0xd   : > { %s1574_s19 = smov (!%p215_p3, %s1149_s19), 1 }
   0xe   : > { %s1333_s28 = smul.u32 24, %s1574_s19 }
  0x10   : > { %s1444_s8 = scalar_lea.vmem %s1567_s0, %s1333_s28  ;;  %s224_s25 = scalar_lea.vmem %s1572_s5, %s1333_s28 }
  0x11   : > { %v226_v6 = vld [vmem:[%s1444_s8] sm:$0xf]  ;;  %v1451_v7 = vld [vmem:[%s1444_s8 + $0x4] sm:$0xf]  ;;  %v1454_v8 = vld [vmem:[%s1444_s8 + $0x8] sm:$0xf] }
  0x12   : > { %v233_v9 = vld [vmem:[%s1444_s8 + $0xc] sm:$0x1]  ;;  %v1156_v10 = vcombine.low %v226_v6, %v1451_v7  ;;  %v1162_v11 = vcombine.low %v1454_v8, %v1454_v8  ;;  %v397_v14 = vld [vmem:[%s1444_s8] sm:$0xe]  ;;  %v1183_v41 = vcombine.low %v1451_v7, %v1454_v8  ;;  %v733_v52 = vld [vmem:[%s1444_s8 + $0x4] sm:$0xc] }
  0x13   : > { %v1461_v12 = vcombine.low %v1454_v8, %v233_v9  ;;  %v1167_v17 = vcombine.low %v397_v14, %v1451_v7  ;;  %v478_v21 = vld [vmem:[%s1444_s8] sm:$0x8]  ;;  %v479_v24 = vld [vmem:[%s1444_s8 + $0xc] sm:$0x7]  ;;  %v734_v53 = vld [vmem:[%s1444_s8 + $0x8] sm:$0xf] }
  0x14   : > { %v250_v15 = vshrl.u32 %v1156_v10, 16  ;;  %v252_v16 = vshll.u32 %v1156_v10, 16  ;;  %1265 = vmatprep.mubr.msk.bf16.mxu1 %vm276_vm0, %v1156_v10  ;;  %v1172_v25 = vcombine.low %v478_v21, %v1451_v7  ;;  %v1173_v27 = vcombine.low %v1454_v8, %v479_v24  ;;  %v563_v34 = vld [vmem:[%s1444_s8 + $0xc] sm:$0xf]  ;;  %v736_v56 = vld [vmem:[%s1444_s8 + $0x10] sm:$0x3] }
  0x15   : > { %v257_v18 = vshll.u32 %v1461_v12, 16  ;;  %v261_v19 = vshrl.u32 %v1461_v12, 16  ;;  %1266 = vmatmul.mubr.msk.bf16.vlgmr.msra.gmra.mrb[0].mxu1 %vm276_vm0, %v1162_v11  ;;  %v407_v20 = vrot.slane %v1461_v12, 1  ;;  %v406_v23 = vrot.slane %v1167_v17, 1  ;;  %v735_v54 = vld [vmem:[%s1444_s8 + $0xc] sm:$0xf] }
  0x16   : > { %v254_v22 = vrot.slane %v252_v16, 1  ;;  %1278 = vmatpush3.bf16.msra.mxu1 %v1350_v5  ;;  %v491_v30 = vrot.slane %v1172_v25, 3  ;;  %v492_v33 = vrot.slane %v1173_v27, 3  ;;  %v1178_v37 = vcombine.low %v1454_v8, %v563_v34  ;;  %v824_v58 = vld [vmem:[%s1444_s8 + $0x10] sm:$0x7]  ;;  %v1366_v5 = vld [vmem:[%s1568_s1 + $0x78] sm:$0xff]  }
  0x17   : > { %v259_v26 = vrot.slane %v257_v18, 1  ;;  %1279 = vmatprep.subr.bf16.mxu1 %v1352_v13  ;;  %v408_v32 = vsel %vm405_vm2, %v406_v23, %v407_v20  ;;  %v573_v38 = vshrl.u32 %v1172_v25, 16  ;;  %v576_v40 = vshll.u32 %v1172_v25, 16  ;;  %v919_v14 = vld [vmem:[%s1444_s8 + $0x4] sm:$0x8]  ;;  %v1365_v16 = vld [vmem:[%s1568_s1 + $0x68] sm:$0xff]  }
  0x18   : > { %v255_v29 = vor.u32 %v254_v22, %v250_v15  ;;  %v493_v39 = vsel %vm490_vm3, %v491_v30, %v492_v33  ;;  %v581_v44 = vshrl.u32 %v1178_v37, 16  ;;  %v584_v45 = vshll.u32 %v1178_v37, 16  ;;  %v1371_v22 = vld [vmem:[%s1568_s1 + $0x88] sm:$0xff]   ;;  %v1373_v24 = vld [vmem:[%s1570_s3] sm:$0xff]  }
  0x19   : > { %v263_v31 = vor.u32 %v261_v19, %v259_v26  ;;  %1281 = vmatprep.mubr.msk.bf16.mxu1 %vm276_vm0, %v493_v39  ;;  %v575_v43 = vrot.slane %v573_v38, 3  ;;  %v578_v47 = vrot.slane %v576_v40, 4  ;;  %v1189_v57 = vcombine.low %v733_v52, %v734_v53  ;;  %v1370_v19 = vld [vmem:[%s1568_s1 + $0x80] sm:$0xff]   ;;  %v1374_v25 = vld [vmem:[%s1570_s3 + $0x8] sm:$0xff]  }
  0x1a   : > { %v260_v35 = vsel %vm248_vm1, %v255_v29, %v259_v26  ;;  %1280 = vmatpush3.bf16.msra.mxu1 %v1352_v13  ;;  %v583_v48 = vrot.slane %v581_v44, 3  ;;  %v586_v49 = vrot.slane %v584_v45, 4  ;;  %v1184_v59 = vcombine.low %v563_v34, %v563_v34 }
  0x1b   : > { %1257 = vmatprep.mubr.msk.bf16.mxu0 %vm276_vm0, %v260_v35  ;;  %1293 = vmatprep.subr.bf16.mxu1 %v1357_v28  ;;  %v579_v51 = vor.u32 %v578_v47, %v575_v43  ;;  %v1195_v60 = vcombine.low %v735_v54, %v824_v58  ;;  %v1190_v63 = vcombine.low %v735_v54, %v736_v56  ;;  %v834_v0 = vshrl.u32 %v1189_v57, 16 }
  0x1c   : > { %1258 = vmatmul.mubr.msk.bf16.vlgmr.msra.gmra.mrb[0].mxu0 %vm276_vm0, %v263_v31  ;;  %v587_v55 = vor.u32 %v586_v49, %v583_v48  ;;  %v837_v1 = vshll.u32 %v1189_v57, 16  ;;  %v752_v10 = vrot.slane %v1189_v57, 2  ;;  %v1200_v18 = vcombine.low %v919_v14, %v734_v53 }
  0x1d   : > { %1270 = vmatpush3.bf16.msra.mxu0 %v1348_v4  ;;  %1273 = vmatprep.mubr.msk.bf16.mxu0 %vm276_vm0, %v408_v32  ;;  %v842_v2 = vshrl.u32 %v1195_v60, 16  ;;  %v845_v3 = vshll.u32 %v1195_v60, 16  ;;  %v1361_v4 = vld [vmem:[%s1568_s1 + $0x60] sm:$0xff]   ;;  %v836_v6 = vrot.slane %v834_v0, 2  ;;  %v753_v11 = vrot.slane %v1190_v63, 2 }
  0x1e   : > { %1271 = vmatprep.subr.bf16.mxu0 %v1351_v36  ;;  %1282 = vmatmul.mubr.msk.bf16.vlgmr.msra.gmra.mrb[4].mxu1 %vm276_vm0, %v492_v33  ;;  %v588_v62 = vsel %vm571_vm4, %v579_v51, %v587_v55  ;;  %v839_v7 = vrot.slane %v837_v1, 3  ;;  %v928_v21 = vrot.slane %v1195_v60, 3 }
  0x1f   : > { %1294 = vmatpush3.bf16.msra.mxu1 %v1357_v28  ;;  %1297 = vmatprep.mubr.msk.bf16.mxu1 %vm276_vm0, %v1183_v41  ;;  %v844_v8 = vrot.slane %v842_v2, 2  ;;  %v847_v9 = vrot.slane %v845_v3, 3  ;;  %v754_v17 = vsel %vm751_vm6, %v752_v10, %v753_v11 }
  0x20   : > { %1295 = vmatprep.subr.bf16.mxu1 %v1359_v42  ;;  %v840_v12 = vor.u32 %v839_v7, %v836_v6 }
  0x21   : > { %1272 = vmatpush3.bf16.msra.mxu0 %v1351_v36  ;;  %v848_v13 = vor.u32 %v847_v9, %v844_v8 }
  0x22   : > { %1285 = vmatprep.subr.bf16.mxu0 %v1354_v46 }
  0x23   : > { %1296 = vmatpush3.bf16.msra.mxu1 %v1359_v42  ;;  %v849_v15 = vsel %vm832_vm5, %v840_v12, %v848_v13 }
  0x24   : > { %1274 = vmatmul.mubr.msk.bf16.vlgmr.msra.gmra.mrb[4].mxu0 %vm276_vm0, %v407_v20  ;;  %1309 = vmatprep.subr.bf16.mxu1 %v1364_v50  ;;  %v927_v20 = vrot.slane %v1200_v18, 3 }
  0x25   : > { %1286 = vmatpush3.bf16.msra.mxu0 %v1354_v46  ;;  %1289 = vmatprep.mubr.msk.bf16.mxu0 %vm276_vm0, %v588_v62 }
  0x26   : > { %1287 = vmatprep.subr.bf16.mxu0 %v1358_v61  ;;  %1298 = vmatmul.mubr.msk.bf16.vlgmr.msra.gmra.mrb[8].mxu1 %vm276_vm0, %v1184_v59  ;;  %v929_v23 = vsel %vm490_vm3, %v927_v20, %v928_v21 }
  0x27   : > { %1310 = vmatpush3.bf16.msra.mxu1 %v1364_v50  ;;  %1313 = vmatprep.mubr.msk.bf16.mxu1 %vm276_vm0, %v849_v15 }
  0x28   : > { %1311 = vmatprep.subr.bf16.mxu1 %v1366_v5 }
  0x29   : > { %1288 = vmatpush3.bf16.msra.mxu0 %v1358_v61 }
  0x2a   : > { %1301 = vmatprep.subr.bf16.mxu0 %v1361_v4 }
  0x2b   : > { %1312 = vmatpush3.bf16.msra.mxu1 %v1366_v5 }
  0x2c   : > { %1290 = vmatmul.mubr.msk.bf16.vlgmr.msra.gmra.mrb[8].mxu0 %vm276_vm0, %v587_v55  ;;  %1325 = vmatprep.subr.bf16.mxu1 %v1373_v24 }
  0x2d   : > { %1302 = vmatpush3.bf16.msra.mxu0 %v1361_v4  ;;  %1305 = vmatprep.mubr.msk.bf16.mxu0 %vm276_vm0, %v754_v17 }
  0x2e   : > { %1303 = vmatprep.subr.bf16.mxu0 %v1365_v16  ;;  %1314 = vmatmul.mubr.msk.bf16.vlgmr.msra.gmra.mrb[12].mxu1 %vm276_vm0, %v848_v13 }
  0x2f   : > { %1326 = vmatpush3.bf16.msra.mxu1 %v1373_v24 }
  0x30   : > { %1327 = vmatprep.subr.bf16.mxu1 %v1374_v25 }
  0x31   : > { %1304 = vmatpush3.bf16.msra.mxu0 %v1365_v16  ;;  %v1205_v16 = vld [vmem:[%s1569_s2] ss:$0 sm:$0xff] }
  0x32   : > { %1317 = vmatprep.subr.bf16.mxu0 %v1370_v19 }
  0x33   : > { %1328 = vmatpush3.bf16.msra.mxu1 %v1374_v25 }
  0x34   : > { %1306 = vmatmul.mubr.msk.bf16.vlgmr.msra.gmra.mrb[12].mxu0 %vm276_vm0, %v753_v11 }
  0x35   : > { %1318 = vmatpush3.bf16.msra.mxu0 %v1370_v19  ;;  %1321 = vmatprep.mubr.msk.bf16.mxu0 %vm276_vm0, %v929_v23 }
  0x36   : > { %1319 = vmatprep.subr.bf16.mxu0 %v1371_v22 }
  0x39   : > { %1320 = vmatpush3.bf16.msra.mxu0 %v1371_v22 }
  0x3c   : > { %1322 = vmatmul.mubr.msk.bf16.vlgmr.msra.gmra.mrb[16].mxu0 %vm276_vm0, %v928_v21 }
  0xe8   : > { %v1267_v26 = vpop.f32.mrb[0].mxu1 }
  0xe9   : > { %v383_v27 = vpop.f32.mrb[1].mxu1 }
  0xea   : > { %v1268_v28 = vpop.f32.mrb[2].mxu1 }
  0xeb   : > { %v386_v29 = vpop.f32.mrb[3].mxu1 }
  0xef   : > { %v1259_v30 = vpop.f32.mrb[0].mxu0 }
  0xf0   : > { %v392_v31 = vadd.f32 %v1267_v26, %v1259_v30  ;;  %v317_v32 = vpop.f32.mrb[1].mxu0 }
  0xf1   : > { %v384_v33 = vadd.f32 %v383_v27, %v317_v32  ;;  %v1260_v34 = vpop.f32.mrb[2].mxu0  ;;  %v1283_v35 = vpop.f32.mrb[4].mxu1 }
  0xf2   : > { %v320_v36 = vpop.f32.mrb[3].mxu0  ;;  %v546_v37 = vpop.f32.mrb[5].mxu1 }
  0xf3   : > { %v387_v38 = vadd.f32 %v386_v29, %v320_v36  ;;  %v1284_v39 = vpop.f32.mrb[6].mxu1 }
  0xf4   : > { %v549_v40 = vpop.f32.mrb[7].mxu1 }
  0xf7   : > { %v1275_v41 = vpop.f32.mrb[4].mxu0 }
  0xf8   : > { %v477_v42 = vadd.f32 %v1275_v41, %v392_v31  ;;  %v461_v43 = vpop.f32.mrb[5].mxu0  ;;  %v1206_v31 = vld [vmem:[%s1571_s4] ss:$0 sm:$0xff] }
  0xf9   : > { %v475_v44 = vadd.f32 %v461_v43, %v384_v33  ;;  %v1276_v45 = vpop.f32.mrb[6].mxu0  ;;  %v1299_v46 = vpop.f32.mrb[8].mxu1 }
  0xfa   : > { %v562_v47 = vadd.f32 %v1283_v35, %v477_v42  ;;  %v464_v48 = vpop.f32.mrb[7].mxu0  ;;  %v716_v49 = vpop.f32.mrb[9].mxu1 }
  0xfb   : > { %v476_v50 = vadd.f32 %v464_v48, %v387_v38  ;;  %v560_v51 = vadd.f32 %v546_v37, %v475_v44  ;;  %v1300_v52 = vpop.f32.mrb[10].mxu1 }
  0xfc   : > { %v719_v53 = vpop.f32.mrb[11].mxu1 }
  0xfd   : > { %v561_v54 = vadd.f32 %v549_v40, %v476_v50 }
  0xff   : > { %v1291_v55 = vpop.f32.mrb[8].mxu0 }
 0x100   : > { %v657_v56 = vadd.f32 %v1291_v55, %v562_v47  ;;  %v641_v57 = vpop.f32.mrb[9].mxu0 }
 0x101   : > { %v655_v58 = vadd.f32 %v641_v57, %v560_v51  ;;  %v1292_v59 = vpop.f32.mrb[10].mxu0  ;;  %v1315_v60 = vpop.f32.mrb[12].mxu1 }
 0x102   : > { %v732_v61 = vadd.f32 %v1299_v46, %v657_v56  ;;  %v644_v62 = vpop.f32.mrb[11].mxu0  ;;  %v902_v63 = vpop.f32.mrb[13].mxu1 }
 0x103   : > { %v656_v0 = vadd.f32 %v644_v62, %v561_v54  ;;  %v730_v1 = vadd.f32 %v716_v49, %v655_v58  ;;  %v1316_v2 = vpop.f32.mrb[14].mxu1 }
 0x104   : > { %v905_v3 = vpop.f32.mrb[15].mxu1 }
 0x105   : > { %v731_v4 = vadd.f32 %v719_v53, %v656_v0 }
 0x107   : > { %v1307_v5 = vpop.f32.mrb[12].mxu0 }
 0x108   : > { %v823_v6 = vadd.f32 %v1307_v5, %v732_v61  ;;  %v807_v7 = vpop.f32.mrb[13].mxu0 }
 0x109   : > { %v821_v8 = vadd.f32 %v807_v7, %v730_v1  ;;  %v1308_v9 = vpop.f32.mrb[14].mxu0 }
 0x10a   : > { %v918_v10 = vadd.f32 %v1315_v60, %v823_v6  ;;  %v810_v11 = vpop.f32.mrb[15].mxu0 }
 0x10b   : > { %v822_v12 = vadd.f32 %v810_v11, %v731_v4  ;;  %v916_v13 = vadd.f32 %v902_v63, %v821_v8 }
 0x10d   : > { %v917_v14 = vadd.f32 %v905_v3, %v822_v12 }
 0x10f   : > { %v1323_v15 = vpop.f32.mrb[16].mxu0 }
 0x110   : > { %v998_v17 = vadd.f32 %v1323_v15, %v918_v10  ;;  %v982_v18 = vpop.f32.mrb[17].mxu0 }
 0x111   : > { %v996_v19 = vadd.f32 %v982_v18, %v916_v13  ;;  %v1324_v20 = vpop.f32.mrb[18].mxu0 }
 0x112   : > { %v1008_v21 = vadd.f32 %v1205_v16, %v998_v17  ;;  %v985_v22 = vpop.f32.mrb[19].mxu0 }
 0x113   : > { %v1006_v23 = vadd.f32 %v1205_v16, %v996_v19  ;;  %v997_v24 = vadd.f32 %v985_v22, %v917_v14 }
 0x114   : > { %v1011_v26 = vmax.f32 %v1008_v21, 0.0 }
 0x115   : > { %v1007_v25 = vadd.f32 %v1205_v16, %v997_v24  ;;  %v1009_v27 = vmax.f32 %v1006_v23, 0.0 }
 0x116   : > { %v1013_v30 = vpack.c.bf16 %v1011_v26, %v1011_v26 }
 0x117   : > { %v1010_v28 = vmax.f32 %v1007_v25, 0.0 }
 0x119   : > { %v1012_v29 = vpack.c.bf16 %v1010_v28, %v1009_v27 }
 0x11b   : > { %1329 = vmatprep.mubr.msk.bf16.mxu1 %vm276_vm0, %v1012_v29 }
 0x11c   : > { %1330 = vmatmul.mubr.msk.bf16.vlgmr.msra.gmra.mrb[16].mxu1 %vm276_vm0, %v1013_v30 }
 0x1ef   : > { %v1331_v32 = vpop.f32.mrb[16].mxu1 }
 0x1f0   : > { %v1086_v33 = vadd.f32 %v1331_v32, %v1206_v31  ;;  %v1077_v34 = vpop.f32.mrb[17].mxu1 }
 0x1f1   : > { %v1078_v35 = vadd.f32 %v1206_v31, %v1077_v34  ;;  %v1332_v36 = vpop.f32.mrb[18].mxu1 }
 0x1f2   : > { %1093 = vst [vmem:[%s224_s25 + $0x10] sm:$0xff] %v1086_v33  ;;  %v1080_v37 = vpop.f32.mrb[19].mxu1 }
 0x1f3   : > { %1091 = vst [vmem:[%s224_s25] sm:$0xff] %v1078_v35  ;;  %v1081_v38 = vadd.f32 %v1206_v31, %v1080_v37 }
 0x1f5   : > { %1092 = vst [vmem:[%s224_s25 + $0x8] sm:$0xff] %v1081_v38 }
 0x1f6 PF: > { %s15_s18 = sadd.s32 1, %s1381_s18  }
 0x1f7   : > { %p12_p4 = scmp.ge.s32.totalorder %s15_s18, 4  }
 0x1f9   :  { %14 = sbr.rel (!%p12_p4) target bundleno = 1 (0x1), region = 70 }

</bundles_post_ra>
